<compile_context>
chip_gen: v5e
topology: v5e:2x2
jax: 0.10.0
libtpu: 0.0.40
codegen_flags: <defaults>
</compile_context>

<pallas_src>
import numpy as np
import jax
import jax.numpy as jnp
from jax.experimental import pallas as pl
from jax.experimental.pallas import tpu as pltpu


# ----------------------------- host-side constant construction ---------------------

def _dft_matrix(N, inverse=False):
    n = np.arange(N)
    k = n[:, None] * n[None, :]
    sign = 1.0 if inverse else -1.0
    F = np.exp(1j * sign * 2.0 * np.pi * k / N)
    if inverse:
        F = F / N
    return F


def _make_transfer(H, W, lam, distance):
    # exact reproduction of Diffraction.light_forward's transfer function
    u = np.fft.fftshift(np.fft.fftfreq(H, d=lam))
    v = np.fft.fftshift(np.fft.fftfreq(W, d=lam))
    fu, fv = np.meshgrid(u, v, indexing="xy")          # square sizes only (as original)
    limit = 1.0 / lam
    mask = (np.hypot(fu, fv) < limit).astype(np.float64)
    arg = 1.0 - (lam * fu) ** 2 - (lam * fv) ** 2
    h = mask * np.exp(1j * 2.0 * np.pi * (distance * lam) / lam * np.sqrt(arg))
    return h


def _gaussian_2d_kernel(kernel_size, sigma, lam):
    # Diffuser.gaussian_2d_kernel
    center = kernel_size // 2
    x = np.linspace((-kernel_size) // 2, kernel_size // 2, kernel_size)
    y = np.linspace(kernel_size // 2, (-kernel_size) // 2, kernel_size)
    mx, my = np.meshgrid(x, y, indexing="xy")
    mask = (np.hypot(mx, my) < center).astype(np.float32)
    s = 2.0 * sigma ** 2
    ii, jj = np.meshgrid(np.arange(kernel_size), np.arange(kernel_size), indexing="ij")
    kern = np.exp(-(((ii - center) * lam) ** 2 + ((jj - center) * lam) ** 2) / s)
    kern = kern * mask
    kern = kern / kern.sum()
    return kern.astype(np.float32)


def _diffuser_phase(key, H, W, lam, miu, sigma0, sigma):
    # Diffuser.diffuserplane + phase normalization from __init__
    ks = int(np.int16(np.sqrt(2.0 * np.log(2.0)) * sigma / lam)) * 2 + 1
    kern = _gaussian_2d_kernel(ks, sigma, lam)
    field = miu + sigma0 * jax.random.normal(
        key, (H + ks - 1, W + ks - 1), dtype=jnp.float32)
    D = jax.lax.conv_general_dilated(
        field[None, None, :, :], jnp.asarray(kern)[None, None, :, :],
        window_strides=(1, 1), padding="VALID")[0, 0]
    phase = (1.5 - 1.0) * D / lam
    phase = 2.0 * np.pi * (phase - phase.min()) / (phase.max() - phase.min())
    return phase  # (H, W) float32


def _build_params(H, W, lam, num_layers, diffuser_phase, tb):
    """Pack all constants into 3 stacked arrays (few pallas_call operands).

    Layout (2x2 real-block complex form, one matmul per complex multiply):
      lmats: (3, 2H, 2H)         [A2, C2, AC2]         (bf16)
      rmats: (3, 2*tbW, 2*tbW)   [B2, D2, DB2]         (bf16, block-diag per image)
      maps : (8, H, tbW)         [h1r,h1i,h2r,h2i,h3r,h3i,diff_r,diff_i]  (f32)
    AC = A@C and DB = D@B are exact fftshift permutation matrices (iDFT->DFT fold).
    """
    assert H == W, "square planes only (matches the original module's usage)"
    FH, FW = _dft_matrix(H), _dft_matrix(W)
    A = np.fft.fftshift(FH, axes=0)        # fftshifted row DFT (applied on the left)
    Bm = np.fft.fftshift(FW, axes=1)       # fftshifted col DFT (applied on the right)
    C = _dft_matrix(H, inverse=True)       # inverse row DFT
    Dm = _dft_matrix(W, inverse=True)      # inverse col DFT
    AC = A @ C                              # exact row-fftshift permutation
    DB = Dm @ Bm                            # exact col-fftshift permutation

    def left_block(M):      # [[Mr,-Mi],[Mi,Mr]]  -> (M) @ x as ONE real matmul
        Mr, Mi = np.real(M), np.imag(M)
        return np.block([[Mr, -Mi], [Mi, Mr]])

    def right_block(M):     # block-diag over width-stacked images, then
        bd = np.kron(np.eye(tb), M)        # [xr|xi] @ [[Nr,Ni],[-Ni,Nr]]
        Nr, Ni = np.real(bd), np.imag(bd)
        return np.block([[Nr, Ni], [-Ni, Nr]])

    lmats = np.stack([left_block(A), left_block(C), left_block(AC)]).astype(np.float32)
    rmats = np.stack([right_block(Bm), right_block(Dm), right_block(DB)]).astype(np.float32)

    h1 = _make_transfer(H, W, lam, 53.0)
    h2 = _make_transfer(H, W, lam, 2.7)
    h3 = _make_transfer(H, W, lam, 9.3)
    pexp = np.exp(1j * np.asarray(diffuser_phase, np.float64))

    def tiled(z):
        zt = np.tile(z, (1, tb))           # replicate per image in the width stack
        return [np.real(zt), np.imag(zt)]

    maps = np.stack(tiled(h1) + tiled(h2) + tiled(h3) + tiled(pexp)).astype(np.float32)

    return {"num_layers": num_layers, "tb": tb,
            "lmats": jnp.asarray(lmats, dtype=jnp.bfloat16),   # (3, 2H, 2H)
            "rmats": jnp.asarray(rmats, dtype=jnp.bfloat16),   # (3, 2tbW, 2tbW)
            "maps": jnp.asarray(maps)}                         # (8, H, tbW) f32


# ----------------------------- Pallas kernel ---------------------------------------

LM_A, LM_C, LM_AC = 0, 1, 2
RM_B, RM_D, RM_DB = 0, 1, 2


def _make_kernel(num_layers, H, TBW):
    bf16, f32 = jnp.bfloat16, jnp.float32

    def kernel(x_ref, lm_ref, rm_ref, map_ref, o_ref):
        def lmul(idx, xr, xi):
            # (Mr + i Mi) @ (xr + i xi) as a single (2H,2H)@(2H,TBW) matmul
            xs = jnp.concatenate([xr, xi], axis=0).astype(bf16)
            y = jnp.dot(lm_ref[idx], xs, preferred_element_type=f32)
            return y[:H, :], y[H:, :]

        def rmul(xr, xi, idx):
            # (xr + i xi) @ (Nr + i Ni) as a single (H,2TBW)@(2TBW,2TBW) matmul
            xs = jnp.concatenate([xr, xi], axis=1).astype(bf16)
            y = jnp.dot(xs, rm_ref[idx], preferred_element_type=f32)
            return y[:, :TBW], y[:, TBW:]

        def hmul(xr, xi, hr, hi):           # elementwise * (hr + i hi), f32
            return xr * hr - xi * hi, xr * hi + xi * hr

        # ---- diffraction 1 (d = 53): real input -> shifted FFT -------------------
        x0 = x_ref[0]                                       # (H, TBW) bf16, real
        xs0 = jnp.concatenate([x0, jnp.zeros_like(x0)], axis=0)
        y = jnp.dot(lm_ref[LM_A], xs0, preferred_element_type=f32)
        xr, xi = y[:H, :], y[H:, :]
        xr, xi = rmul(xr, xi, RM_B)
        xr, xi = hmul(xr, xi, map_ref[0], map_ref[1])       # * H(53)
        xr, xi = lmul(LM_C, xr, xi)
        xr, xi = rmul(xr, xi, RM_D)                         # back to spatial domain

        # ---- ground-glass diffuser: x *= exp(1j * phase) --------------------------
        xr, xi = hmul(xr, xi, map_ref[6], map_ref[7])

        if num_layers >= 1:
            # first modulation layer: (shifted) FFT, then * H(2.7)
            xr, xi = lmul(LM_A, xr, xi)
            xr, xi = rmul(xr, xi, RM_B)
            h2r, h2i = map_ref[2], map_ref[3]               # hoisted out of the loop
            xr, xi = hmul(xr, xi, h2r, h2i)
            # interior boundaries: iFFT->FFT folded into the exact permutation
            # matrices AC / DB (2 matmuls instead of 8, no extra rounding)
            for _ in range(num_layers - 1):
                xr, xi = lmul(LM_AC, xr, xi)
                xr, xi = rmul(xr, xi, RM_DB)
                xr, xi = hmul(xr, xi, h2r, h2i)
            # output layer (d = 9.3) shares the folded boundary
            xr, xi = lmul(LM_AC, xr, xi)
            xr, xi = rmul(xr, xi, RM_DB)
            xr, xi = hmul(xr, xi, map_ref[4], map_ref[5])
        else:
            # no modulation layers: go straight to the d = 9.3 output propagation
            xr, xi = lmul(LM_A, xr, xi)
            xr, xi = rmul(xr, xi, RM_B)
            xr, xi = hmul(xr, xi, map_ref[4], map_ref[5])

        # ---- final inverse FFT back to the image plane, then tanh(|x|^2) ----------
        xr, xi = lmul(LM_C, xr, xi)
        xr, xi = rmul(xr, xi, RM_D)
        o_ref[0] = jnp.tanh(xr * xr + xi * xi)              # lane-dense f32 store

    return kernel


def _pick_tb(n_imgs, W):
    """Number of images stacked along the lane (width) axis per grid step.

    Target 128 lanes per step (lane-dense stores, v5e MXU width, keeps the
    kron(I_tb, .) right matrices small) but guarantee >= 2 grid steps whenever
    >= 2 images exist, so the "parallel" grid axis can shard across v7x's two
    TensorCores instead of leaving one idle.
    """
    tb_full = max(1, 128 // W)
    if n_imgs >= 2 * tb_full:
        return tb_full                       # >= 2 lane-dense (128-wide) steps
    return max(1, -(-n_imgs // 2))           # small batch: split across 2 steps


def incoherent_light_net_forward(x, params):
    B, C, H, W = x.shape
    n = B * C
    tb = params["tb"]
    tbw = tb * W
    g = -(-n // tb)                          # cdiv
    pad = g * tb - n

    xf = x.reshape(n, H, W).astype(jnp.bfloat16)
    if pad:
        xf = jnp.concatenate([xf, jnp.zeros((pad, H, W), jnp.bfloat16)], axis=0)
    # (g, tb, H, W) -> (g, H, tb, W) -> (g, H, tb*W): width-stacked lane-dense slabs
    xs = xf.reshape(g, tb, H, W).transpose(0, 2, 1, 3).reshape(g, H, tbw)

    img_spec = pl.BlockSpec((1, H, tbw), lambda i: (i, 0, 0))
    lm_spec = pl.BlockSpec((3, 2 * H, 2 * H), lambda i: (0, 0, 0))
    rm_spec = pl.BlockSpec((3, 2 * tbw, 2 * tbw), lambda i: (0, 0, 0))
    mp_spec = pl.BlockSpec((8, H, tbw), lambda i: (0, 0, 0))

    nl = params["num_layers"]
    n_left = nl + 4                          # left matmuls per grid step
    n_right = nl + 4                         # right matmuls per grid step
    flops = g * (n_left * 2 * (2 * H) * (2 * H) * tbw
                 + n_right * 2 * H * (2 * tbw) * (2 * tbw))
    bytes_accessed = (int(xs.size) * 2 + g * H * tbw * 4
                      + int(params["lmats"].size) * 2
                      + int(params["rmats"].size) * 2
                      + int(params["maps"].size) * 4)
    cost = pl.CostEstimate(flops=int(flops),
                           transcendentals=int(g * H * tbw),
                           bytes_accessed=int(bytes_accessed))

    out = pl.pallas_call(
        _make_kernel(nl, H, tbw),
        out_shape=jax.ShapeDtypeStruct((g, H, tbw), jnp.float32),
        grid_spec=pltpu.PrefetchScalarGridSpec(
            num_scalar_prefetch=0,
            grid=(g,),
            in_specs=[img_spec, lm_spec, rm_spec, mp_spec],
            out_specs=img_spec),
        compiler_params=pltpu.CompilerParams(
            dimension_semantics=("parallel",),
            vmem_limit_bytes=32 * 1024 * 1024),
        cost_estimate=cost,
    )(xs, params["lmats"], params["rmats"], params["maps"])

    out = out.reshape(g, H, tb, W).transpose(0, 2, 1, 3).reshape(g * tb, H, W)
    return out[:n].reshape(B, C, H, W)


# ----------------------------- pure-JAX reference (jnp.fft) for validation ---------

def reference_forward(x, lam, diffuser, num_layers):
    H, W = x.shape[-2:]
    u = jnp.fft.fftshift(jnp.fft.fftfreq(H, d=lam))
    v = jnp.fft.fftshift(jnp.fft.fftfreq(W, d=lam))
    fu, fv = jnp.meshgrid(u, v, indexing="xy")
    mask = jnp.hypot(fu, fv) < (1.0 / lam)

    def light_forward(img, distance):
        k = jnp.fft.fftshift(jnp.fft.fft2(img), axes=(2, 3))
        h = mask * jnp.exp(1j * 2 * jnp.pi * (distance * lam) / lam
                           * jnp.sqrt(1.0 - (lam * fu) ** 2 - (lam * fv) ** 2))
        return jnp.fft.ifft2(k * h)

    y = light_forward(x.astype(jnp.complex64), 53.0)
    y = y * jnp.exp(1j * diffuser.astype(jnp.complex64))
    for _ in range(num_layers):
        y = light_forward(y, 2.7)
    y = light_forward(y, 9.3)
    return jnp.tanh(jnp.abs(y) ** 2)


# ----------------------------- main -------------------------------------------------

if __name__ == "__main__":
    key = jax.random.PRNGKey(0)
    k_img, k_diff = jax.random.split(key)

    # module hyper-parameters (small, consistent with __init__).
    # 16 images of 16x16 -> tb = 8 (128 lanes per slab) and g = 2 grid steps,
    # so both v7x TensorCores get work (per review item 4).
    B, C, H, W = 2, 8, 16, 16
    num_layers = 2
    lam = 1.0
    miu, sigma0, sigma = 0.0, 1.0, 3.0

    x = jax.random.uniform(k_img, (B, C, H, W), dtype=jnp.float32)
    diffuser = _diffuser_phase(k_diff, H, W, lam, miu, sigma0, sigma)

    n_imgs = B * C
    tb = _pick_tb(n_imgs, W)                     # -> 8 images per step, tb*W = 128

    params = _build_params(H, W, lam, num_layers, np.asarray(diffuser), tb)

    out = incoherent_light_net_forward(x, params)
    out = jax.block_until_ready(out)

    ref = reference_forward(x, lam, diffuser, num_layers)
    # bf16 MXU operands (same rounding DEFAULT-precision f32 dots apply) across the
    # chained DFT stages; the AC/DB interior folds are exact permutations, so the
    # error budget is smaller than the previous (unfused) version at the same
    # tolerance.
    np.testing.assert_allclose(np.asarray(out), np.asarray(ref), rtol=5e-2, atol=2e-2)

    print("KERNEL_OK")
</pallas_src>

<mosaic_0001>
module attributes {stable_mosaic.version = 11 : i64} {
  func.func @kernel(%arg0: i32, %arg1: memref<1x16x128xbf16, #tpu.memory_space<vmem>>, %arg2: memref<3x32x32xbf16, #tpu.memory_space<vmem>>, %arg3: memref<3x256x256xbf16, #tpu.memory_space<vmem>>, %arg4: memref<8x16x128xf32, #tpu.memory_space<vmem>>, %arg5: memref<1x16x128xf32, #tpu.memory_space<vmem>>) attributes {dimension_semantics = [#tpu.dimension_semantics<parallel>], iteration_bounds = array<i64: 2>, scalar_prefetch = 0 : i64, scratch_operands = 0 : i64, tpu.core_type = #tpu.core_type<tc>, window_params = [{transform_indices = @transform_0, window_bounds = array<i64: 1, 16, 128>}, {pipeline_mode = #tpu.pipeline_mode<synchronous>, transform_indices = @transform_1, window_bounds = array<i64: 3, 32, 32>}, {pipeline_mode = #tpu.pipeline_mode<synchronous>, transform_indices = @transform_2, window_bounds = array<i64: 3, 256, 256>}, {pipeline_mode = #tpu.pipeline_mode<synchronous>, transform_indices = @transform_3, window_bounds = array<i64: 8, 16, 128>}, {transform_indices = @transform_4, window_bounds = array<i64: 1, 16, 128>}]} {
    %c0 = arith.constant 0 : index
    %c0_0 = arith.constant 0 : index
    %c0_1 = arith.constant 0 : index
    %0 = vector.load %arg1[%c0, %c0_0, %c0_1] : memref<1x16x128xbf16, #tpu.memory_space<vmem>>, vector<1x16x128xbf16>
    %1 = vector.shape_cast %0 : vector<1x16x128xbf16> to vector<16x128xbf16>
    %cst = arith.constant 0.000000e+00 : bf16
    %2 = vector.broadcast %cst : bf16 to vector<16x128xbf16>
    %3 = tpu.concatenate %1, %2 in 0 : vector<16x128xbf16>, vector<16x128xbf16> -> vector<32x128xbf16>
    %c0_2 = arith.constant 0 : index
    %c0_3 = arith.constant 0 : index
    %c0_4 = arith.constant 0 : index
    %4 = vector.load %arg2[%c0_2, %c0_3, %c0_4] : memref<3x32x32xbf16, #tpu.memory_space<vmem>>, vector<1x32x32xbf16>
    %5 = vector.shape_cast %4 : vector<1x32x32xbf16> to vector<32x32xbf16>
    %cst_5 = arith.constant dense<0.000000e+00> : vector<32x128xf32>
    %6 = tpu.matmul %5, %3, %cst_5 {dimension_numbers = #tpu.dot_dimension_numbers<[1], [0], [0], [1], [0, 0, 1, 1], [], []>} : vector<32x32xbf16>, vector<32x128xbf16>, vector<32x128xf32> -> vector<32x128xf32>
    %7 = vector.extract_strided_slice %6 {offsets = [0, 0], sizes = [16, 128], strides = [1, 1]} : vector<32x128xf32> to vector<16x128xf32>
    %8 = vector.extract_strided_slice %6 {offsets = [16, 0], sizes = [16, 128], strides = [1, 1]} : vector<32x128xf32> to vector<16x128xf32>
    %9 = tpu.concatenate %7, %8 in 1 : vector<16x128xf32>, vector<16x128xf32> -> vector<16x256xf32>
    %10 = arith.truncf %9 : vector<16x256xf32> to vector<16x256xbf16>
    %c0_6 = arith.constant 0 : index
    %c0_7 = arith.constant 0 : index
    %c0_8 = arith.constant 0 : index
    %11 = vector.load %arg3[%c0_6, %c0_7, %c0_8] : memref<3x256x256xbf16, #tpu.memory_space<vmem>>, vector<1x256x256xbf16>
    %12 = vector.shape_cast %11 : vector<1x256x256xbf16> to vector<256x256xbf16>
    %cst_9 = arith.constant dense<0.000000e+00> : vector<16x256xf32>
    %13 = tpu.matmul %10, %12, %cst_9 {dimension_numbers = #tpu.dot_dimension_numbers<[1], [0], [0], [1], [0, 0, 1, 1], [], []>} : vector<16x256xbf16>, vector<256x256xbf16>, vector<16x256xf32> -> vector<16x256xf32>
    %14 = vector.extract_strided_slice %13 {offsets = [0, 0], sizes = [16, 128], strides = [1, 1]} : vector<16x256xf32> to vector<16x128xf32>
    %15 = vector.extract_strided_slice %13 {offsets = [0, 128], sizes = [16, 128], strides = [1, 1]} : vector<16x256xf32> to vector<16x128xf32>
    %c0_10 = arith.constant 0 : index
    %c0_11 = arith.constant 0 : index
    %c0_12 = arith.constant 0 : index
    %16 = vector.load %arg4[%c0_10, %c0_11, %c0_12] : memref<8x16x128xf32, #tpu.memory_space<vmem>>, vector<1x16x128xf32>
    %17 = vector.shape_cast %16 : vector<1x16x128xf32> to vector<16x128xf32>
    %c1 = arith.constant 1 : index
    %c0_13 = arith.constant 0 : index
    %c0_14 = arith.constant 0 : index
    %18 = vector.load %arg4[%c1, %c0_13, %c0_14] : memref<8x16x128xf32, #tpu.memory_space<vmem>>, vector<1x16x128xf32>
    %19 = vector.shape_cast %18 : vector<1x16x128xf32> to vector<16x128xf32>
    %20 = arith.mulf %14, %17 : vector<16x128xf32>
    %21 = arith.mulf %15, %19 : vector<16x128xf32>
    %22 = arith.subf %20, %21 : vector<16x128xf32>
    %23 = arith.mulf %14, %19 : vector<16x128xf32>
    %24 = arith.mulf %15, %17 : vector<16x128xf32>
    %25 = arith.addf %23, %24 : vector<16x128xf32>
    %26 = tpu.concatenate %22, %25 in 0 : vector<16x128xf32>, vector<16x128xf32> -> vector<32x128xf32>
    %27 = arith.truncf %26 : vector<32x128xf32> to vector<32x128xbf16>
    %c1_15 = arith.constant 1 : index
    %c0_16 = arith.constant 0 : index
    %c0_17 = arith.constant 0 : index
    %28 = vector.load %arg2[%c1_15, %c0_16, %c0_17] : memref<3x32x32xbf16, #tpu.memory_space<vmem>>, vector<1x32x32xbf16>
    %29 = vector.shape_cast %28 : vector<1x32x32xbf16> to vector<32x32xbf16>
    %cst_18 = arith.constant dense<0.000000e+00> : vector<32x128xf32>
    %30 = tpu.matmul %29, %27, %cst_18 {dimension_numbers = #tpu.dot_dimension_numbers<[1], [0], [0], [1], [0, 0, 1, 1], [], []>} : vector<32x32xbf16>, vector<32x128xbf16>, vector<32x128xf32> -> vector<32x128xf32>
    %31 = vector.extract_strided_slice %30 {offsets = [0, 0], sizes = [16, 128], strides = [1, 1]} : vector<32x128xf32> to vector<16x128xf32>
    %32 = vector.extract_strided_slice %30 {offsets = [16, 0], sizes = [16, 128], strides = [1, 1]} : vector<32x128xf32> to vector<16x128xf32>
    %33 = tpu.concatenate %31, %32 in 1 : vector<16x128xf32>, vector<16x128xf32> -> vector<16x256xf32>
    %34 = arith.truncf %33 : vector<16x256xf32> to vector<16x256xbf16>
    %c1_19 = arith.constant 1 : index
    %c0_20 = arith.constant 0 : index
    %c0_21 = arith.constant 0 : index
    %35 = vector.load %arg3[%c1_19, %c0_20, %c0_21] : memref<3x256x256xbf16, #tpu.memory_space<vmem>>, vector<1x256x256xbf16>
    %36 = vector.shape_cast %35 : vector<1x256x256xbf16> to vector<256x256xbf16>
    %cst_22 = arith.constant dense<0.000000e+00> : vector<16x256xf32>
    %37 = tpu.matmul %34, %36, %cst_22 {dimension_numbers = #tpu.dot_dimension_numbers<[1], [0], [0], [1], [0, 0, 1, 1], [], []>} : vector<16x256xbf16>, vector<256x256xbf16>, vector<16x256xf32> -> vector<16x256xf32>
    %38 = vector.extract_strided_slice %37 {offsets = [0, 0], sizes = [16, 128], strides = [1, 1]} : vector<16x256xf32> to vector<16x128xf32>
    %39 = vector.extract_strided_slice %37 {offsets = [0, 128], sizes = [16, 128], strides = [1, 1]} : vector<16x256xf32> to vector<16x128xf32>
    %c6 = arith.constant 6 : index
    %c0_23 = arith.constant 0 : index
    %c0_24 = arith.constant 0 : index
    %40 = vector.load %arg4[%c6, %c0_23, %c0_24] : memref<8x16x128xf32, #tpu.memory_space<vmem>>, vector<1x16x128xf32>
    %41 = vector.shape_cast %40 : vector<1x16x128xf32> to vector<16x128xf32>
    %c7 = arith.constant 7 : index
    %c0_25 = arith.constant 0 : index
    %c0_26 = arith.constant 0 : index
    %42 = vector.load %arg4[%c7, %c0_25, %c0_26] : memref<8x16x128xf32, #tpu.memory_space<vmem>>, vector<1x16x128xf32>
    %43 = vector.shape_cast %42 : vector<1x16x128xf32> to vector<16x128xf32>
    %44 = arith.mulf %38, %41 : vector<16x128xf32>
    %45 = arith.mulf %39, %43 : vector<16x128xf32>
    %46 = arith.subf %44, %45 : vector<16x128xf32>
    %47 = arith.mulf %38, %43 : vector<16x128xf32>
    %48 = arith.mulf %39, %41 : vector<16x128xf32>
    %49 = arith.addf %47, %48 : vector<16x128xf32>
    %50 = tpu.concatenate %46, %49 in 0 : vector<16x128xf32>, vector<16x128xf32> -> vector<32x128xf32>
    %51 = arith.truncf %50 : vector<32x128xf32> to vector<32x128xbf16>
    %c0_27 = arith.constant 0 : index
    %c0_28 = arith.constant 0 : index
    %c0_29 = arith.constant 0 : index
    %52 = vector.load %arg2[%c0_27, %c0_28, %c0_29] : memref<3x32x32xbf16, #tpu.memory_space<vmem>>, vector<1x32x32xbf16>
    %53 = vector.shape_cast %52 : vector<1x32x32xbf16> to vector<32x32xbf16>
    %cst_30 = arith.constant dense<0.000000e+00> : vector<32x128xf32>
    %54 = tpu.matmul %53, %51, %cst_30 {dimension_numbers = #tpu.dot_dimension_numbers<[1], [0], [0], [1], [0, 0, 1, 1], [], []>} : vector<32x32xbf16>, vector<32x128xbf16>, vector<32x128xf32> -> vector<32x128xf32>
    %55 = vector.extract_strided_slice %54 {offsets = [0, 0], sizes = [16, 128], strides = [1, 1]} : vector<32x128xf32> to vector<16x128xf32>
    %56 = vector.extract_strided_slice %54 {offsets = [16, 0], sizes = [16, 128], strides = [1, 1]} : vector<32x128xf32> to vector<16x128xf32>
    %57 = tpu.concatenate %55, %56 in 1 : vector<16x128xf32>, vector<16x128xf32> -> vector<16x256xf32>
    %58 = arith.truncf %57 : vector<16x256xf32> to vector<16x256xbf16>
    %c0_31 = arith.constant 0 : index
    %c0_32 = arith.constant 0 : index
    %c0_33 = arith.constant 0 : index
    %59 = vector.load %arg3[%c0_31, %c0_32, %c0_33] : memref<3x256x256xbf16, #tpu.memory_space<vmem>>, vector<1x256x256xbf16>
    %60 = vector.shape_cast %59 : vector<1x256x256xbf16> to vector<256x256xbf16>
    %cst_34 = arith.constant dense<0.000000e+00> : vector<16x256xf32>
    %61 = tpu.matmul %58, %60, %cst_34 {dimension_numbers = #tpu.dot_dimension_numbers<[1], [0], [0], [1], [0, 0, 1, 1], [], []>} : vector<16x256xbf16>, vector<256x256xbf16>, vector<16x256xf32> -> vector<16x256xf32>
    %62 = vector.extract_strided_slice %61 {offsets = [0, 0], sizes = [16, 128], strides = [1, 1]} : vector<16x256xf32> to vector<16x128xf32>
    %63 = vector.extract_strided_slice %61 {offsets = [0, 128], sizes = [16, 128], strides = [1, 1]} : vector<16x256xf32> to vector<16x128xf32>
    %c2 = arith.constant 2 : index
    %c0_35 = arith.constant 0 : index
    %c0_36 = arith.constant 0 : index
    %64 = vector.load %arg4[%c2, %c0_35, %c0_36] : memref<8x16x128xf32, #tpu.memory_space<vmem>>, vector<1x16x128xf32>
    %65 = vector.shape_cast %64 : vector<1x16x128xf32> to vector<16x128xf32>
    %c3 = arith.constant 3 : index
    %c0_37 = arith.constant 0 : index
    %c0_38 = arith.constant 0 : index
    %66 = vector.load %arg4[%c3, %c0_37, %c0_38] : memref<8x16x128xf32, #tpu.memory_space<vmem>>, vector<1x16x128xf32>
    %67 = vector.shape_cast %66 : vector<1x16x128xf32> to vector<16x128xf32>
    %68 = arith.mulf %62, %65 : vector<16x128xf32>
    %69 = arith.mulf %63, %67 : vector<16x128xf32>
    %70 = arith.subf %68, %69 : vector<16x128xf32>
    %71 = arith.mulf %62, %67 : vector<16x128xf32>
    %72 = arith.mulf %63, %65 : vector<16x128xf32>
    %73 = arith.addf %71, %72 : vector<16x128xf32>
    %74 = tpu.concatenate %70, %73 in 0 : vector<16x128xf32>, vector<16x128xf32> -> vector<32x128xf32>
    %75 = arith.truncf %74 : vector<32x128xf32> to vector<32x128xbf16>
    %c2_39 = arith.constant 2 : index
    %c0_40 = arith.constant 0 : index
    %c0_41 = arith.constant 0 : index
    %76 = vector.load %arg2[%c2_39, %c0_40, %c0_41] : memref<3x32x32xbf16, #tpu.memory_space<vmem>>, vector<1x32x32xbf16>
    %77 = vector.shape_cast %76 : vector<1x32x32xbf16> to vector<32x32xbf16>
    %cst_42 = arith.constant dense<0.000000e+00> : vector<32x128xf32>
    %78 = tpu.matmul %77, %75, %cst_42 {dimension_numbers = #tpu.dot_dimension_numbers<[1], [0], [0], [1], [0, 0, 1, 1], [], []>} : vector<32x32xbf16>, vector<32x128xbf16>, vector<32x128xf32> -> vector<32x128xf32>
    %79 = vector.extract_strided_slice %78 {offsets = [0, 0], sizes = [16, 128], strides = [1, 1]} : vector<32x128xf32> to vector<16x128xf32>
    %80 = vector.extract_strided_slice %78 {offsets = [16, 0], sizes = [16, 128], strides = [1, 1]} : vector<32x128xf32> to vector<16x128xf32>
    %81 = tpu.concatenate %79, %80 in 1 : vector<16x128xf32>, vector<16x128xf32> -> vector<16x256xf32>
    %82 = arith.truncf %81 : vector<16x256xf32> to vector<16x256xbf16>
    %c2_43 = arith.constant 2 : index
    %c0_44 = arith.constant 0 : index
    %c0_45 = arith.constant 0 : index
    %83 = vector.load %arg3[%c2_43, %c0_44, %c0_45] : memref<3x256x256xbf16, #tpu.memory_space<vmem>>, vector<1x256x256xbf16>
    %84 = vector.shape_cast %83 : vector<1x256x256xbf16> to vector<256x256xbf16>
    %cst_46 = arith.constant dense<0.000000e+00> : vector<16x256xf32>
    %85 = tpu.matmul %82, %84, %cst_46 {dimension_numbers = #tpu.dot_dimension_numbers<[1], [0], [0], [1], [0, 0, 1, 1], [], []>} : vector<16x256xbf16>, vector<256x256xbf16>, vector<16x256xf32> -> vector<16x256xf32>
    %86 = vector.extract_strided_slice %85 {offsets = [0, 0], sizes = [16, 128], strides = [1, 1]} : vector<16x256xf32> to vector<16x128xf32>
    %87 = vector.extract_strided_slice %85 {offsets = [0, 128], sizes = [16, 128], strides = [1, 1]} : vector<16x256xf32> to vector<16x128xf32>
    %88 = arith.mulf %86, %65 : vector<16x128xf32>
    %89 = arith.mulf %87, %67 : vector<16x128xf32>
    %90 = arith.subf %88, %89 : vector<16x128xf32>
    %91 = arith.mulf %86, %67 : vector<16x128xf32>
    %92 = arith.mulf %87, %65 : vector<16x128xf32>
    %93 = arith.addf %91, %92 : vector<16x128xf32>
    %94 = tpu.concatenate %90, %93 in 0 : vector<16x128xf32>, vector<16x128xf32> -> vector<32x128xf32>
    %95 = arith.truncf %94 : vector<32x128xf32> to vector<32x128xbf16>
    %c2_47 = arith.constant 2 : index
    %c0_48 = arith.constant 0 : index
    %c0_49 = arith.constant 0 : index
    %96 = vector.load %arg2[%c2_47, %c0_48, %c0_49] : memref<3x32x32xbf16, #tpu.memory_space<vmem>>, vector<1x32x32xbf16>
    %97 = vector.shape_cast %96 : vector<1x32x32xbf16> to vector<32x32xbf16>
    %cst_50 = arith.constant dense<0.000000e+00> : vector<32x128xf32>
    %98 = tpu.matmul %97, %95, %cst_50 {dimension_numbers = #tpu.dot_dimension_numbers<[1], [0], [0], [1], [0, 0, 1, 1], [], []>} : vector<32x32xbf16>, vector<32x128xbf16>, vector<32x128xf32> -> vector<32x128xf32>
    %99 = vector.extract_strided_slice %98 {offsets = [0, 0], sizes = [16, 128], strides = [1, 1]} : vector<32x128xf32> to vector<16x128xf32>
    %100 = vector.extract_strided_slice %98 {offsets = [16, 0], sizes = [16, 128], strides = [1, 1]} : vector<32x128xf32> to vector<16x128xf32>
    %101 = tpu.concatenate %99, %100 in 1 : vector<16x128xf32>, vector<16x128xf32> -> vector<16x256xf32>
    %102 = arith.truncf %101 : vector<16x256xf32> to vector<16x256xbf16>
    %c2_51 = arith.constant 2 : index
    %c0_52 = arith.constant 0 : index
    %c0_53 = arith.constant 0 : index
    %103 = vector.load %arg3[%c2_51, %c0_52, %c0_53] : memref<3x256x256xbf16, #tpu.memory_space<vmem>>, vector<1x256x256xbf16>
    %104 = vector.shape_cast %103 : vector<1x256x256xbf16> to vector<256x256xbf16>
    %cst_54 = arith.constant dense<0.000000e+00> : vector<16x256xf32>
    %105 = tpu.matmul %102, %104, %cst_54 {dimension_numbers = #tpu.dot_dimension_numbers<[1], [0], [0], [1], [0, 0, 1, 1], [], []>} : vector<16x256xbf16>, vector<256x256xbf16>, vector<16x256xf32> -> vector<16x256xf32>
    %106 = vector.extract_strided_slice %105 {offsets = [0, 0], sizes = [16, 128], strides = [1, 1]} : vector<16x256xf32> to vector<16x128xf32>
    %107 = vector.extract_strided_slice %105 {offsets = [0, 128], sizes = [16, 128], strides = [1, 1]} : vector<16x256xf32> to vector<16x128xf32>
    %c4 = arith.constant 4 : index
    %c0_55 = arith.constant 0 : index
    %c0_56 = arith.constant 0 : index
    %108 = vector.load %arg4[%c4, %c0_55, %c0_56] : memref<8x16x128xf32, #tpu.memory_space<vmem>>, vector<1x16x128xf32>
    %109 = vector.shape_cast %108 : vector<1x16x128xf32> to vector<16x128xf32>
    %c5 = arith.constant 5 : index
    %c0_57 = arith.constant 0 : index
    %c0_58 = arith.constant 0 : index
    %110 = vector.load %arg4[%c5, %c0_57, %c0_58] : memref<8x16x128xf32, #tpu.memory_space<vmem>>, vector<1x16x128xf32>
    %111 = vector.shape_cast %110 : vector<1x16x128xf32> to vector<16x128xf32>
    %112 = arith.mulf %106, %109 : vector<16x128xf32>
    %113 = arith.mulf %107, %111 : vector<16x128xf32>
    %114 = arith.subf %112, %113 : vector<16x128xf32>
    %115 = arith.mulf %106, %111 : vector<16x128xf32>
    %116 = arith.mulf %107, %109 : vector<16x128xf32>
    %117 = arith.addf %115, %116 : vector<16x128xf32>
    %118 = tpu.concatenate %114, %117 in 0 : vector<16x128xf32>, vector<16x128xf32> -> vector<32x128xf32>
    %119 = arith.truncf %118 : vector<32x128xf32> to vector<32x128xbf16>
    %c1_59 = arith.constant 1 : index
    %c0_60 = arith.constant 0 : index
    %c0_61 = arith.constant 0 : index
    %120 = vector.load %arg2[%c1_59, %c0_60, %c0_61] : memref<3x32x32xbf16, #tpu.memory_space<vmem>>, vector<1x32x32xbf16>
    %121 = vector.shape_cast %120 : vector<1x32x32xbf16> to vector<32x32xbf16>
    %cst_62 = arith.constant dense<0.000000e+00> : vector<32x128xf32>
    %122 = tpu.matmul %121, %119, %cst_62 {dimension_numbers = #tpu.dot_dimension_numbers<[1], [0], [0], [1], [0, 0, 1, 1], [], []>} : vector<32x32xbf16>, vector<32x128xbf16>, vector<32x128xf32> -> vector<32x128xf32>
    %123 = vector.extract_strided_slice %122 {offsets = [0, 0], sizes = [16, 128], strides = [1, 1]} : vector<32x128xf32> to vector<16x128xf32>
    %124 = vector.extract_strided_slice %122 {offsets = [16, 0], sizes = [16, 128], strides = [1, 1]} : vector<32x128xf32> to vector<16x128xf32>
    %125 = tpu.concatenate %123, %124 in 1 : vector<16x128xf32>, vector<16x128xf32> -> vector<16x256xf32>
    %126 = arith.truncf %125 : vector<16x256xf32> to vector<16x256xbf16>
    %c1_63 = arith.constant 1 : index
    %c0_64 = arith.constant 0 : index
    %c0_65 = arith.constant 0 : index
    %127 = vector.load %arg3[%c1_63, %c0_64, %c0_65] : memref<3x256x256xbf16, #tpu.memory_space<vmem>>, vector<1x256x256xbf16>
    %128 = vector.shape_cast %127 : vector<1x256x256xbf16> to vector<256x256xbf16>
    %cst_66 = arith.constant dense<0.000000e+00> : vector<16x256xf32>
    %129 = tpu.matmul %126, %128, %cst_66 {dimension_numbers = #tpu.dot_dimension_numbers<[1], [0], [0], [1], [0, 0, 1, 1], [], []>} : vector<16x256xbf16>, vector<256x256xbf16>, vector<16x256xf32> -> vector<16x256xf32>
    %130 = vector.extract_strided_slice %129 {offsets = [0, 0], sizes = [16, 128], strides = [1, 1]} : vector<16x256xf32> to vector<16x128xf32>
    %131 = vector.extract_strided_slice %129 {offsets = [0, 128], sizes = [16, 128], strides = [1, 1]} : vector<16x256xf32> to vector<16x128xf32>
    %132 = arith.mulf %130, %130 : vector<16x128xf32>
    %133 = arith.mulf %131, %131 : vector<16x128xf32>
    %134 = arith.addf %132, %133 : vector<16x128xf32>
    %135 = math.tanh %134 : vector<16x128xf32>
    %c0_67 = arith.constant 0 : index
    %c0_68 = arith.constant 0 : index
    %c0_69 = arith.constant 0 : index
    %136 = vector.load %arg5[%c0_67, %c0_68, %c0_69] : memref<1x16x128xf32, #tpu.memory_space<vmem>>, vector<1x16x128xf32>
    %137 = vector.shape_cast %136 : vector<1x16x128xf32> to vector<16x128xf32>
    %138 = vector.shape_cast %135 : vector<16x128xf32> to vector<1x16x128xf32>
    tpu.vector_store %arg5[%c0_67, %c0_68, %c0_69], %138 {strides = array<i32>} : memref<1x16x128xf32, #tpu.memory_space<vmem>>, vector<1x16x128xf32>,
    return
  }
  func.func @transform_0(%arg0: i32) -> (i32, i32, i32) {
    %c0_i32 = arith.constant 0 : i32
    %c0_i32_0 = arith.constant 0 : i32
    %c0_i32_1 = arith.constant 0 : i32
    return %arg0, %c0_i32, %c0_i32_0 : i32, i32, i32
  }
  func.func @transform_1(%arg0: i32) -> (i32, i32, i32) {
    %c0_i32 = arith.constant 0 : i32
    %c0_i32_0 = arith.constant 0 : i32
    %c0_i32_1 = arith.constant 0 : i32
    %c0_i32_2 = arith.constant 0 : i32
    return %c0_i32, %c0_i32_0, %c0_i32_1 : i32, i32, i32
  }
  func.func @transform_2(%arg0: i32) -> (i32, i32, i32) {
    %c0_i32 = arith.constant 0 : i32
    %c0_i32_0 = arith.constant 0 : i32
    %c0_i32_1 = arith.constant 0 : i32
    %c0_i32_2 = arith.constant 0 : i32
    return %c0_i32, %c0_i32_0, %c0_i32_1 : i32, i32, i32
  }
  func.func @transform_3(%arg0: i32) -> (i32, i32, i32) {
    %c0_i32 = arith.constant 0 : i32
    %c0_i32_0 = arith.constant 0 : i32
    %c0_i32_1 = arith.constant 0 : i32
    %c0_i32_2 = arith.constant 0 : i32
    return %c0_i32, %c0_i32_0, %c0_i32_1 : i32, i32, i32
  }
  func.func @transform_4(%arg0: i32) -> (i32, i32, i32) {
    %c0_i32 = arith.constant 0 : i32
    %c0_i32_0 = arith.constant 0 : i32
    %c0_i32_1 = arith.constant 0 : i32
    return %arg0, %c0_i32, %c0_i32_0 : i32, i32, i32
  }
}

</mosaic_0001>

<bundles_post_ra>
// kernel: tpu_custom_call.1
= control target key start
LH: loop header
LB: loop body
LE: loop exit
PB: predicated region body
PF: predicated region fallthrough
CT: control target
= control target key end

     0   :  { %9 = vsyncpa [#allocation3], 0  ;;  %s3048_s0 = inlined_call_operand.hbm [shape: bf16[2,16,128], index: 0, kind: input, shape index: {}]   ;;  %s3049_s1 = inlined_call_operand.hbm [shape: bf16[3,32,32], index: 1, kind: input, shape index: {}]   ;;  %s3050_s2 = inlined_call_operand.hbm [shape: bf16[3,256,256], index: 2, kind: input, shape index: {}]   ;;  %s3051_s3 = inlined_call_operand.hbm [shape: f32[8,16,128], index: 3, kind: input, shape index: {}]   ;;  %s3052_s4 = inlined_call_operand.hbm [shape: f32[2,16,128], index: 4, kind: output, shape index: {}]  }
   0x1   :  { %11 = vsyncpa [#allocation3 + $0x1], 0 }
   0x2   :  { %12 = vsyncpa [#allocation6], 0 }
   0x3   :  { %13 = vsyncpa [#allocation9], 0 }
   0x4   :  { %14 = vsyncpa [#allocation4], 0 }
   0x5   :  { %16 = vsyncpa [#allocation4 + $0x1], 0  ;;  %s2467_s15 = smov 0   ;;  %s2469_s16 = smov 0  }
   0x6   :  { %s2471_s17 = smov 0   ;;  %s2473_s18 = smov 0  }
   0x7 LB: > { %s2488_s19 = sadd.s32 4294967295, %s2431_s18   ;;  %s1601_s20 = sadd.s32 4294967294, %s2431_s18   ;;  %s2431_s18 = sphi %s2473_s18, %s3117_s18   ;;  %s2427_s17 = sphi %s2471_s17, %s3116_s17   ;;  %s2423_s16 = sphi %s2469_s16, %s3115_s16   ;;  %s2419_s15 = sphi %s2467_s15, %s3114_s15  }
   0x8   : > { %p42_p0 = scmp.ne.s32.totalorder %s2423_s16, %s2419_s15  ;;  %p43_p1 = scmp.eq.s32.totalorder %s2488_s19, 0 }
   0x9   : > { %p129_p2 = scmp.eq.s32.totalorder %s2488_s19, 1  ;;  %p135_p3 = scmp.eq.s32.totalorder %s1601_s20, 1 }
   0xa   : > { %p2497_p4 = por %p43_p1, %p42_p0  ;;  %p1602_p5 = scmp.ge.s32.totalorder %s2431_s18, 1 }
   0xb   : > { %p2502_p6 = por %p135_p3, %p42_p0  ;;  %p142_p7 = scmp.lt.s32.totalorder %s2431_s18, 3 }
   0xc   : > { %s153_s25 = sshll.u32 %s3049_s1, 4  ;;  %s2433_s27 = smov [#allocation5]   ;;  %s154_s25 = int_to_ptr.hbm [resolvable:$true] %s153_s25 }
   0xd   : > { %p2510_p8 = pnand %p1602_p5, %p142_p7  ;;  %s155_s28 = sshll.u32 %s2433_s27, 4  ;;  %s156_s28 = int_to_ptr.vmem [resolvable:$true] %s155_s28 }
   0xe   : > { %s167_s6 = sshll.u32 %s3050_s2, 4  ;;  %s2434_s7 = smov 64   ;;  %s168_s6 = int_to_ptr.hbm [resolvable:$true] %s167_s6 }
   0xf   : > { %p2166_p9 = pneg %p2510_p8  ;;  %s2435_s8 = smov 4  }
  0x10   : > { %s2436_s9 = smov [#allocation7]   ;;  %s2437_s11 = smov 128  }
  0x11   : > { %p2518_p10 = pnand %p2166_p9, %p43_p1  ;;  %s169_s10 = sshll.u32 %s2436_s9, 4  ;;  %s170_s10 = int_to_ptr.vmem [resolvable:$true] %s169_s10 }
  0x12   : > { %s2438_s12 = smov 8   ;;  %s181_s20 = sshll.u32 %s3051_s3, 4  ;;  %s182_s20 = int_to_ptr.hbm [resolvable:$true] %s181_s20 }
  0x13   : > { %2169 = dma.hbm_to_vmem [thread:$0]  (!%p2518_p10), %s154_s25, 768, %s156_s28, [#allocation6], %s2434_s7, %s2434_s7, %s2435_s8  }
  0x14   : > { %2172 = dma.hbm_to_vmem [thread:$0]  (!%p2518_p10), %s168_s6, 12288, %s170_s10, [#allocation6], %s2437_s11, %s2437_s11, %s2438_s12  }
  0x15   : > { %s2439_s23 = smov [#allocation8]   ;;  %s2539_s25 = sadd.s32 1, %s2431_s18  }
  0x16   : > { %s183_s24 = sshll.u32 %s2439_s23, 4  ;;  %s26_s27 = ssub.s32 %s2431_s18, %s2539_s25  ;;  %s184_s24 = int_to_ptr.vmem [resolvable:$true] %s183_s24 }
  0x17   : > { %2175 = dma.hbm_to_vmem [thread:$0]  (!%p2518_p10), %s182_s20, 2048, %s184_s24, [#allocation9], %s2437_s11, %s2437_s11, %s2438_s12  }
  0x18   : > { %s29_s28 = sadd.s32 1, %s2427_s17  ;;  %p27_p12 = scmp.eq.s32.totalorder %s26_s27, 0 }
  0x19   : > { %p36_p13 = scmp.ne.s32.totalorder %s2427_s17, %s2423_s16  ;;  %p37_p0 = scmp.eq.s32.totalorder %s2431_s18, 0 }
  0x1a   : > { %s2548_s30 = scalar_select %p27_p12, %s2427_s17, %s29_s28  }
  0x1b   : > { %p2552_p3 = por %p129_p2, %p36_p13  ;;  %p2187_p5 = scmp.lt.s32.totalorder %s2431_s18, 2 }
  0x1c   : > { %s197_s6 = sand.u32 1, %s2427_s17   ;;  %s2045_s9 = sshll.u32 %s2431_s18, 3 }
  0x1d   : > { %p38_p7 = por %p37_p0, %p36_p13  ;;  %s1607_s29 = sshll.u32 %s197_s6, 3 }
  0x1e   : > { %s206_s12 = scalar_lea.hbm %s3048_s0, %s2045_s9  ;;  %s201_s14 = scalar_lea.vmem [#allocation2], %s1607_s29 }
  0x1f   : > { %s207_s13 = sshll.u32 %s206_s12, 4  ;;  %s209_s20 = sshll.u32 %s201_s14, 4  ;;  %s208_s13 = int_to_ptr.hbm [resolvable:$true] %s207_s13  ;;  %s210_s20 = int_to_ptr.vmem [resolvable:$true] %s209_s20 }
  0x20   : > { %p2562_p9 = pnand %p2187_p5, %p38_p7  ;;  %s198_s24 = scalar_lea.sflag [#allocation3], %s197_s6 }
  0x21   : > { %s2327_s27 = sshra.s32 %s208_s13, 4  ;;  %s2334_s29 = scalar_lea.hbm %s3048_s0, 16  ;;  %s2328_s27 = int_to_ptr.hbm [resolvable:$true] %s2327_s27 }
  0x22   : > { %s2329_s28 = scalar_lea.hbm %s2328_s27, 8  ;;  %p2331_p10 = pneg %p2562_p9 }
  0x23   : > { %p2330_p2 = scmp.ne.s32.totalorder %s2328_s27, %s2329_s28  ;;  %p2335_p0 = scmp.lt.s32.totalorder %s2328_s27, %s3048_s0 }
  0x24   : > { %p2336_p5 = scmp.lt.s32.totalorder %s2334_s29, %s2329_s28 }
  0x25   : > { %p2332_p12 = pnand %p2331_p10, %p2330_p2 }
  0x26   : > { %p2337_p7 = por %p2336_p5, %p2335_p0 }
  0x27   : > { %p2333_p13 = pneg %p2332_p12 }
  0x29   : > { %p2338_p11 = pnand %p2337_p7, %p2333_p13 }
  0x2b   : > { %2341 = shalt.err (!%p2338_p11)
}
  0x2c   : > { %2179 = dma.hbm_to_vmem [thread:$0]  (!%p2562_p9), %s208_s13, 128, %s210_s20, %s198_s24, %s2434_s7, %s2434_s7, %s2435_s8  }
  0x2d   : > { %221 = sbr.rel (%p2510_p8) target bundleno = 1918 (0x77e), region = 36 }
  0x32   : > { %s2582_s6 = sand.u32 1, %s2423_s16  }
  0x33   : > { %s1611_s14 = sshll.u32 %s2582_s6, 3  ;;  %s224_s27 = scalar_lea.sflag [#allocation3], %s2582_s6 }
  0x34   : > { %s227_s28 = scalar_lea.vmem [#allocation2], %s1611_s14 }
  0x35   : > { %2402 = dma.done.wait (%p2497_p4), %s224_s27, 128  }
  0x36   : > { %2404 = vsyncadd (%p2497_p4), %s224_s27, 4294967168 }
  0x37   : > { %2406 = dma.done.wait (%p43_p1), [#allocation6], 13056  }
  0x38   : > { %2408 = vsyncadd (%p43_p1), [#allocation6], 4294954240 }
  0x39   : > { %2410 = dma.done.wait (%p43_p1), [#allocation9], 2048  }
  0x3a   : > { %2412 = vsyncadd (%p43_p1), [#allocation9], 4294965248  ;;  %v2046_v0 = vld [vmem:[%s227_s28] sm:$0xff]  ;;  %v2598_v1 = vld [vmem:[#allocation5] sm:$0xff]  ;;  %vm291_vm0 = vcmask 261120   ;;  %s1615_s21 = sshll.u32 %s2582_s6, 4 }
  0x3b   : > { %v1688_v2 = vld [vmem:[#allocation7 + $0x70] sm:$0xf]  ;;  %v2064_v3 = vld [vmem:[#allocation7 + $0x74] sm:$0xf0]  ;;  %v2063_v4 = vld [vmem:[#allocation7 + $0x74] sm:$0xf]  ;;  %305 = vmatpush.bf16.msra.mxu0 %v2046_v0 }
  0x3c   : > { %v2600_v5 = vor.u32 %v2064_v3, %v1688_v2  ;;  %v1690_v6 = vld [vmem:[#allocation7 + $0x78] sm:$0xf0]  ;;  %v1680_v7 = vld [vmem:[#allocation7 + $0x60] sm:$0xf]  ;;  %v2062_v8 = vld [vmem:[#allocation7 + $0x64] sm:$0xf0] }
  0x3d   : > { %v2602_v9 = vor.u32 %v2063_v4, %v1690_v6  ;;  %v2061_v10 = vld [vmem:[#allocation7 + $0x64] sm:$0xf]  ;;  %v1682_v11 = vld [vmem:[#allocation7 + $0x68] sm:$0xf0]  ;;  %v2605_v12 = vor.u32 %v2062_v8, %v1680_v7  ;;  %v1672_v14 = vld [vmem:[#allocation7 + $0x50] sm:$0xf] }
  0x3e   : > { %511 = vmatpush.bf16.msra.mxu1 %v2600_v5  ;;  %1628 = vmatmul.msk.bf16.vlgmr.msra.gmra.mxu0 %vm291_vm0, %v2598_v1  ;;  %v2610_v13 = vor.u32 %v2061_v10, %v1682_v11  ;;  %v2060_v15 = vld [vmem:[#allocation7 + $0x54] sm:$0xf0]  ;;  %v2059_v16 = vld [vmem:[#allocation7 + $0x54] sm:$0xf]  ;;  %v1674_v17 = vld [vmem:[#allocation7 + $0x58] sm:$0xf0] }
  0x3f   : > { %539 = vmatpush.bf16.msra.mxu3 %v2602_v9  ;;  %v1752_v18 = vld [vmem:[#allocation7 + $0xf0] sm:$0xf]  ;;  %v2080_v19 = vld [vmem:[#allocation7 + $0xf4] sm:$0xf0]  ;;  %v2613_v20 = vor.u32 %v2060_v15, %v1672_v14  ;;  %v2079_v22 = vld [vmem:[#allocation7 + $0xf4] sm:$0xf]  ;;  %v2618_v24 = vor.u32 %v2059_v16, %v1674_v17 }
  0x40   : > { %v2615_v21 = vor.u32 %v2080_v19, %v1752_v18  ;;  %v1754_v23 = vld [vmem:[#allocation7 + $0xf8] sm:$0xf0]  ;;  %v1664_v25 = vld [vmem:[#allocation7 + $0x40] sm:$0xf]  ;;  %v2058_v26 = vld [vmem:[#allocation7 + $0x44] sm:$0xf0] }
  0x41   : > { %v2620_v27 = vor.u32 %v2079_v22, %v1754_v23  ;;  %v2057_v28 = vld [vmem:[#allocation7 + $0x44] sm:$0xf]  ;;  %v1666_v29 = vld [vmem:[#allocation7 + $0x48] sm:$0xf0]  ;;  %v2625_v30 = vor.u32 %v2058_v26, %v1664_v25  ;;  %v1656_v32 = vld [vmem:[#allocation7 + $0x30] sm:$0xf] }
  0x42   : > { %512 = vmatpush.bf16.msra.mxu1 %v2605_v12  ;;  %525 = vmatpush.bf16.msra.mxu2 %v2615_v21  ;;  %v2628_v31 = vor.u32 %v2057_v28, %v1666_v29  ;;  %v2056_v33 = vld [vmem:[#allocation7 + $0x34] sm:$0xf0]  ;;  %v2055_v34 = vld [vmem:[#allocation7 + $0x34] sm:$0xf]  ;;  %v1658_v35 = vld [vmem:[#allocation7 + $0x38] sm:$0xf0] }
  0x43   : > { %540 = vmatpush.bf16.msra.mxu3 %v2610_v13  ;;  %553 = vmatpush.bf16.msrb.mxu0 %v2620_v27  ;;  %v2631_v36 = vor.u32 %v2056_v33, %v1656_v32  ;;  %v2633_v37 = vld [vmem:[#allocation5 + $0x8] sm:$0xff]  ;;  %v2636_v38 = vor.u32 %v2055_v34, %v1658_v35  ;;  %v1648_v39 = vld [vmem:[#allocation7 + $0x20] sm:$0xf]  ;;  %v2054_v40 = vld [vmem:[#allocation7 + $0x24] sm:$0xf0]  ;;  %s2149_s26 = sshll.u32 %s2488_s19, 4 }
  0x44   : > { %v1744_v41 = vld [vmem:[#allocation7 + $0xe0] sm:$0xf]  ;;  %v2642_v42 = vor.u32 %v2054_v40, %v1648_v39  ;;  %v2078_v43 = vld [vmem:[#allocation7 + $0xe4] sm:$0xf0]  ;;  %v2053_v44 = vld [vmem:[#allocation7 + $0x24] sm:$0xf]  ;;  %s1495_s13 = scalar_lea.hbm %s3052_s4, %s2149_s26 }
  0x45   : > { %v1650_v45 = vld [vmem:[#allocation7 + $0x28] sm:$0xf0]  ;;  %v2644_v46 = vor.u32 %v2078_v43, %v1744_v41  ;;  %v2077_v48 = vld [vmem:[#allocation7 + $0xe4] sm:$0xf]  ;;  %v1640_v51 = vld [vmem:[#allocation7 + $0x10] sm:$0xf] }
  0x46   : > { %513 = vmatpush.bf16.msra.mxu1 %v2613_v20  ;;  %v2646_v47 = vor.u32 %v2053_v44, %v1650_v45  ;;  %v1746_v49 = vld [vmem:[#allocation7 + $0xe8] sm:$0xf0]  ;;  %v2052_v52 = vld [vmem:[#allocation7 + $0x14] sm:$0xf0]  ;;  %v1736_v53 = vld [vmem:[#allocation7 + $0xd0] sm:$0xf] }
  0x47   : > { %541 = vmatpush.bf16.msra.mxu3 %v2618_v24  ;;  %v2649_v50 = vor.u32 %v2077_v48, %v1746_v49  ;;  %526 = vmatpush.bf16.msra.mxu2 %v2644_v46  ;;  %v2653_v54 = vor.u32 %v2052_v52, %v1640_v51  ;;  %v2076_v55 = vld [vmem:[#allocation7 + $0xd4] sm:$0xf0]  ;;  %v2051_v56 = vld [vmem:[#allocation7 + $0x14] sm:$0xf]  ;;  %v1642_v57 = vld [vmem:[#allocation7 + $0x18] sm:$0xf0] }
  0x48   : > { %v2656_v58 = vor.u32 %v2076_v55, %v1736_v53  ;;  %v2658_v59 = vor.u32 %v2051_v56, %v1642_v57  ;;  %v2075_v60 = vld [vmem:[#allocation7 + $0xd4] sm:$0xf]  ;;  %v1738_v61 = vld [vmem:[#allocation7 + $0xd8] sm:$0xf0]  ;;  %v1632_v63 = vld [vmem:[#allocation7] sm:$0xf] }
  0x49   : > { %554 = vmatpush.bf16.msrb.mxu0 %v2649_v50  ;;  %v2660_v62 = vor.u32 %v2075_v60, %v1738_v61  ;;  %v2050_v0 = vld [vmem:[#allocation7 + $0x4] sm:$0xf0]  ;;  %v1728_v2 = vld [vmem:[#allocation7 + $0xc0] sm:$0xf]  ;;  %v2049_v6 = vld [vmem:[#allocation7 + $0x4] sm:$0xf] }
  0x4a   : > { %514 = vmatpush.bf16.msra.mxu1 %v2625_v30  ;;  %v2666_v3 = vor.u32 %v2050_v0, %v1632_v63  ;;  %v2074_v4 = vld [vmem:[#allocation7 + $0xc4] sm:$0xf0]  ;;  %v1634_v7 = vld [vmem:[#allocation7 + $0x8] sm:$0xf0]  ;;  %v2073_v11 = vld [vmem:[#allocation7 + $0xc4] sm:$0xf] }
  0x4b   : > { %542 = vmatpush.bf16.msra.mxu3 %v2628_v31  ;;  %527 = vmatpush.bf16.msra.mxu2 %v2656_v58  ;;  %v2668_v8 = vor.u32 %v2074_v4, %v1728_v2  ;;  %v2670_v10 = vor.u32 %v2049_v6, %v1634_v7  ;;  %v1730_v14 = vld [vmem:[#allocation7 + $0xc8] sm:$0xf0]  ;;  %v1720_v16 = vld [vmem:[#allocation7 + $0xb0] sm:$0xf]  ;;  %v2072_v17 = vld [vmem:[#allocation7 + $0xb4] sm:$0xf0] }
  0x4c   : > { %v2673_v15 = vor.u32 %v2073_v11, %v1730_v14  ;;  %v2071_v18 = vld [vmem:[#allocation7 + $0xb4] sm:$0xf]  ;;  %v2678_v19 = vor.u32 %v2072_v17, %v1720_v16  ;;  %v1722_v22 = vld [vmem:[#allocation7 + $0xb8] sm:$0xf0]  ;;  %v1712_v25 = vld [vmem:[#allocation7 + $0xa0] sm:$0xf] }
  0x4d   : > { %555 = vmatpush.bf16.msrb.mxu0 %v2660_v62  ;;  %v2680_v23 = vor.u32 %v2071_v18, %v1722_v22  ;;  %v2070_v26 = vld [vmem:[#allocation7 + $0xa4] sm:$0xf0]  ;;  %v2069_v28 = vld [vmem:[#allocation7 + $0xa4] sm:$0xf]  ;;  %v1714_v32 = vld [vmem:[#allocation7 + $0xa8] sm:$0xf0] }
  0x4e   : > { %515 = vmatpush.bf16.msra.mxu1 %v2631_v36  ;;  %1629 = vmatmul.msk.bf16.gmra.mxu0 %vm291_vm0, %v2633_v37  ;;  %v2684_v29 = vor.u32 %v2070_v26, %v1712_v25  ;;  %v2686_v33 = vor.u32 %v2069_v28, %v1714_v32  ;;  %v1704_v34 = vld [vmem:[#allocation7 + $0x90] sm:$0xf]  ;;  %v2068_v35 = vld [vmem:[#allocation7 + $0x94] sm:$0xf0]  ;;  %v2067_v39 = vld [vmem:[#allocation7 + $0x94] sm:$0xf] }
  0x4f   : > { %543 = vmatpush.bf16.msra.mxu3 %v2636_v38  ;;  %528 = vmatpush.bf16.msra.mxu2 %v2668_v8  ;;  %v2689_v40 = vor.u32 %v2068_v35, %v1704_v34  ;;  %v1706_v41 = vld [vmem:[#allocation7 + $0x98] sm:$0xf0]  ;;  %v1696_v44 = vld [vmem:[#allocation7 + $0x80] sm:$0xf]  ;;  %v2066_v45 = vld [vmem:[#allocation7 + $0x84] sm:$0xf0] }
  0x50   : > { %v2692_v43 = vor.u32 %v2067_v39, %v1706_v41  ;;  %v2065_v48 = vld [vmem:[#allocation7 + $0x84] sm:$0xf]  ;;  %v2696_v49 = vor.u32 %v2066_v45, %v1696_v44  ;;  %v1698_v51 = vld [vmem:[#allocation7 + $0x88] sm:$0xf0]  ;;  %v570_v17 = vld [vmem:[#allocation8 + $0x10] sm:$0xff]  ;;  %s267_s20 = scalar_lea.vmem [#allocation10], %s1615_s21 }
  0x51   : > { %556 = vmatpush.bf16.msrb.mxu0 %v2673_v15  ;;  %v2698_v52 = vor.u32 %v2065_v48, %v1698_v51  ;;  %v567_v16 = vld [vmem:[#allocation8] sm:$0xff]  ;;  %v568_v22 = vld [vmem:[#allocation8 + $0x8] sm:$0xff]  ;;  %v1826_v28 = vld [vmem:[#allocation7 + $0x170] sm:$0xf]  ;;  %s1496_s23 = sshll.u32 %s267_s20, 4  ;;  %s1498_s24 = sshll.u32 %s1495_s13, 4  ;;  %s1497_s23 = int_to_ptr.vmem [resolvable:$true] %s1496_s23  ;;  %s1499_s24 = int_to_ptr.hbm [resolvable:$true] %s1498_s24 }
  0x52   : > { %516 = vmatpush.bf16.msra.mxu1 %v2642_v42  ;;  %3077 = vst [vmem:[#allocation15_spill] sm:$0xff] %v2692_v43  ;;  %v2098_v32 = vld [vmem:[#allocation7 + $0x174] sm:$0xf0]  ;;  %v2097_v34 = vld [vmem:[#allocation7 + $0x174] sm:$0xf]  ;;  %s1484_s9 = scalar_lea.sflag [#allocation4], %s2582_s6 }
  0x53   : > { %544 = vmatpush.bf16.msra.mxu3 %v2646_v47  ;;  %529 = vmatpush.bf16.msra.mxu2 %v2678_v19  ;;  %3078 = vst [vmem:[#allocation16_spill] sm:$0xff] %v2698_v52  ;;  %v2702_v41 = vor.u32 %v2098_v32, %v1826_v28  ;;  %v1828_v44 = vld [vmem:[#allocation7 + $0x178] sm:$0xf0]  ;;  %v1818_v45 = vld [vmem:[#allocation7 + $0x160] sm:$0xf]  ;;  %s2371_s19 = sshra.s32 %s1499_s24, 4  ;;  %s2372_s19 = int_to_ptr.hbm [resolvable:$true] %s2371_s19 }
  0x54   : > { %v2096_v48 = vld [vmem:[#allocation7 + $0x164] sm:$0xf0]  ;;  %v2093_v32 = vld [vmem:[#allocation7 + $0x154] sm:$0xf]  ;;  %s2373_s10 = scalar_lea.hbm %s2372_s19, 16  ;;  %s2377_s12 = scalar_lea.hbm %s3052_s4, 32 }
  0x55   : > { %557 = vmatpush.bf16.msrb.mxu0 %v2680_v23  ;;  %p2374_p1 = scmp.ne.s32.totalorder %s2372_s19, %s2373_s10  ;;  %p2378_p11 = scmp.lt.s32.totalorder %s2372_s19, %s3052_s4 }
  0x56   : > { %517 = vmatpush.bf16.msra.mxu1 %v2653_v54  ;;  %p2379_p9 = scmp.lt.s32.totalorder %s2377_s12, %s2373_s10 }
  0x57   : > { %545 = vmatpush.bf16.msra.mxu3 %v2658_v59  ;;  %530 = vmatpush.bf16.msra.mxu2 %v2684_v29  ;;  %p2375_p4 = pnand %p2374_p1, %p2552_p3 }
  0x58   : > { %p2380_p2 = por %p2379_p9, %p2378_p11 }
  0x59   : > { %558 = vmatpush.bf16.msrb.mxu0 %v2686_v33  ;;  %p2376_p8 = pneg %p2375_p4 }
  0x5a   : > { %518 = vmatpush.bf16.msra.mxu1 %v2666_v3 }
  0x5b   : > { %546 = vmatpush.bf16.msra.mxu3 %v2670_v10  ;;  %531 = vmatpush.bf16.msra.mxu2 %v2689_v40  ;;  %p2381_p10 = pnand %p2380_p2, %p2376_p8 }
  0x5d   : > { %559 = vmatpush.bf16.msrb.mxu0 %v2692_v43 }
  0x5f   : > { %532 = vmatpush.bf16.msra.mxu2 %v2696_v49 }
  0x61   : > { %560 = vmatpush.bf16.msrb.mxu0 %v2698_v52  ;;  %v1890_v52 = vld [vmem:[#allocation7 + $0x1f0] sm:$0xf] }
  0x63   : > { %821 = vmatpush.bf16.msrb.mxu2 %v2702_v41 }
  0xbb   : > { %v307_v53 = vpop.f32.mrf.mxu0 }
  0xc3   : > { %v309_v55 = vpop.f32.mrf.mxu0 }
  0xc4   : > { %v317_v56 = vpack.c.bf16 %v309_v55, %v307_v53  ;;  %v571_v53 = vld [vmem:[#allocation8 + $0x18] sm:$0xff]  ;;  %v2704_v55 = vor.u32 %v2097_v34, %v1828_v44 }
  0xc5   : > { %v1812_v34 = vld [vmem:[#allocation7 + $0x158] sm:$0xf0] }
  0xc6   : > { %519 = vmatmul.bf16.vlgmr.msra.gmra.mxu1 %v317_v56  ;;  %547 = vmatmul.bf16.vlgmr.msra.gmra.mxu3 %v317_v56  ;;  %v2095_v56 = vld [vmem:[#allocation7 + $0x164] sm:$0xf] }
  0xc7   : > { %849 = vmatpush.bf16.msra.mxu0 %v2704_v55 }
  0xcb   : > { %v312_v57 = vpop.f32.mrf.mxu0 }
  0xd3   : > { %v314_v60 = vpop.f32.mrf.mxu0 }
  0xd4   : > { %v318_v61 = vpack.c.bf16 %v314_v60, %v312_v57  ;;  %v1820_v57 = vld [vmem:[#allocation7 + $0x168] sm:$0xf0] }
  0xd6   : > { %533 = vmatmul.bf16.vlgmr.msra.gmra.mxu2 %v318_v61  ;;  %561 = vmatmul.bf16.vlgmr.msrb.gmra.mxu0 %v318_v61 }
 0x143   : > { %v520_v2 = vpop.f32.mrf.mxu1 }
 0x149   : > { %v548_v0 = vpop.f32.mrf.mxu3 }
 0x14b   : > { %v522_v25 = vpop.f32.mrf.mxu1 }
 0x151   : > { %v550_v11 = vpop.f32.mrf.mxu3 }
 0x153   : > { %v562_v63 = vpop.f32.mrf.mxu0 }
 0x154   : > { %v563_v14 = vadd.f32 %v562_v63, %v548_v0  ;;  %v2707_v0 = vor.u32 %v2096_v48, %v1818_v45 }
 0x156   : > { %v580_v51 = vmul.f32 %v567_v16, %v563_v14  ;;  %v574_v44 = vmul.f32 %v570_v17, %v563_v14  ;;  %822 = vmatpush.bf16.msrb.mxu2 %v2707_v0 }
 0x159   : > { %v534_v4 = vpop.f32.mrf.mxu2 }
 0x15a   : > { %v535_v7 = vadd.f32 %v534_v4, %v520_v2  ;;  %v2710_v2 = vor.u32 %v2095_v56, %v1820_v57  ;;  %v1810_v4 = vld [vmem:[#allocation7 + $0x150] sm:$0xf]  ;;  %v2113_v56 = vld [vmem:[#allocation7 + $0x1f4] sm:$0xf]  ;;  %v1892_v57 = vld [vmem:[#allocation7 + $0x1f8] sm:$0xf0] }
 0x15b   : > { %v564_v6 = vpop.f32.mrf.mxu0 }
 0x15c   : > { %v565_v18 = vadd.f32 %v564_v6, %v550_v11  ;;  %v578_v35 = vmul.f32 %v570_v17, %v535_v7  ;;  %v2094_v6 = vld [vmem:[#allocation7 + $0x154] sm:$0xf0]  ;;  %v572_v11 = vmul.f32 %v567_v16, %v535_v7  ;;  %850 = vmatpush.bf16.msra.mxu0 %v2710_v2  ;;  %v2718_v7 = vor.u32 %v2093_v32, %v1812_v34  ;;  %v1802_v16 = vld [vmem:[#allocation7 + $0x140] sm:$0xf]  ;;  %v2091_v17 = vld [vmem:[#allocation7 + $0x144] sm:$0xf] }
 0x15d   : > { %v2713_v45 = vor.u32 %v2094_v6, %v1810_v4  ;;  %v2090_v4 = vld [vmem:[#allocation7 + $0x134] sm:$0xf0]  ;;  %v2089_v6 = vld [vmem:[#allocation7 + $0x134] sm:$0xf]  ;;  %v2088_v32 = vld [vmem:[#allocation7 + $0x124] sm:$0xf0] }
 0x15e   : > { %v581_v60 = vmul.f32 %v568_v22, %v565_v18  ;;  %3079 = vst [vmem:[#allocation17_spill] sm:$0xff] %v2718_v7  ;;  %v576_v14 = vsub.f32 %v572_v11, %v574_v44  ;;  %v1796_v11 = vld [vmem:[#allocation7 + $0x138] sm:$0xf0]  ;;  %v1882_v34 = vld [vmem:[#allocation7 + $0x1e0] sm:$0xf] }
 0x15f   : > { %823 = vmatpush.bf16.msrb.mxu2 %v2713_v45 }
 0x160   : > { %851 = vmatpush.bf16.msra.mxu0 %v2718_v7  ;;  %v2133_v7 = vld [vmem:[#allocation7 + $0x284] sm:$0xf] }
 0x161   : > { %v536_v26 = vpop.f32.mrf.mxu2 }
 0x162   : > { %v537_v39 = vadd.f32 %v536_v26, %v522_v25  ;;  %v575_v25 = vmul.f32 %v571_v53, %v565_v18  ;;  %v582_v26 = vadd.f32 %v580_v51, %v578_v35  ;;  %v2092_v18 = vld [vmem:[#allocation7 + $0x144] sm:$0xf0]  ;;  %v1804_v35 = vld [vmem:[#allocation7 + $0x148] sm:$0xf0]  ;;  %v2721_v51 = vor.u32 %v2113_v56, %v1892_v57 }
 0x163   : > { %v1788_v56 = vld [vmem:[#allocation7 + $0x128] sm:$0xf0] }
 0x164   : > { %v573_v61 = vmul.f32 %v568_v22, %v537_v39  ;;  %v579_v63 = vmul.f32 %v571_v53, %v537_v39  ;;  %v2114_v22 = vld [vmem:[#allocation7 + $0x1f4] sm:$0xf0]  ;;  %3080 = vst [vmem:[#allocation18_spill] sm:$0xff] %v2721_v51 }
 0x165   : > { %v2715_v48 = vor.u32 %v2114_v22, %v1890_v52  ;;  %v2724_v52 = vor.u32 %v2092_v18, %v1802_v16  ;;  %v2112_v22 = vld [vmem:[#allocation7 + $0x1e4] sm:$0xf0]  ;;  %v2111_v18 = vld [vmem:[#allocation7 + $0x1e4] sm:$0xf] }
 0x166   : > { %v583_v28 = vadd.f32 %v581_v60, %v579_v63  ;;  %v577_v43 = vsub.f32 %v573_v61, %v575_v25  ;;  %v2726_v60 = vld [vmem:[#allocation5 + $0x10] sm:$0xff]  ;;  %v2729_v61 = vor.u32 %v2091_v17, %v1804_v35  ;;  %v1794_v63 = vld [vmem:[#allocation7 + $0x130] sm:$0xf]  ;;  %v2738_v25 = vor.u32 %v2089_v6, %v1796_v11  ;;  %v2110_v6 = vld [vmem:[#allocation7 + $0x1d4] sm:$0xf0] }
 0x167   : > { %835 = vmatpush.bf16.msrb.mxu3 %v2715_v48  ;;  %3081 = vst [vmem:[#allocation19_spill] sm:$0xff] %v2726_v60  ;;  %824 = vmatpush.bf16.msrb.mxu2 %v2724_v52  ;;  %v2748_v57 = vor.u32 %v2112_v22, %v1882_v34  ;;  %v1778_v35 = vld [vmem:[#allocation7 + $0x110] sm:$0xf]  ;;  %v2085_v11 = vld [vmem:[#allocation7 + $0x114] sm:$0xf] }
 0x168   : > { %v585_v39 = vpack.c.bf16 %v583_v28, %v582_v26  ;;  %v584_v53 = vpack.c.bf16 %v577_v43, %v576_v14  ;;  %3082 = vst [vmem:[#allocation20_spill] sm:$0xff] %v2729_v61  ;;  %v2733_v43 = vor.u32 %v2090_v4, %v1794_v63  ;;  %852 = vmatpush.bf16.msra.mxu0 %v2729_v61  ;;  %v2742_v26 = vld [vmem:[#allocation5 + $0x18] sm:$0xff]  ;;  %v1786_v28 = vld [vmem:[#allocation7 + $0x120] sm:$0xf]  ;;  %v1874_v63 = vld [vmem:[#allocation7 + $0x1d0] sm:$0xf] }
 0x169   : > { %3083 = vst [vmem:[#allocation21_spill] sm:$0xff] %v2738_v25  ;;  %v2746_v44 = vor.u32 %v2088_v32, %v1786_v28  ;;  %v1884_v14 = vld [vmem:[#allocation7 + $0x1e8] sm:$0xf0]  ;;  %v1780_v28 = vld [vmem:[#allocation7 + $0x118] sm:$0xf0]  ;;  %v2760_v32 = vor.u32 %v2110_v6, %v1874_v63 }
 0x16a   : > { %613 = vmatpush.bf16.msrb.mxu1 %v585_v39  ;;  %3084 = vst [vmem:[#allocation22_spill] sm:$0xff] %v2742_v26  ;;  %v2087_v39 = vld [vmem:[#allocation7 + $0x124] sm:$0xf]  ;;  %v2753_v17 = vor.u32 %v2111_v18, %v1884_v14  ;;  %v2762_v34 = vor.u32 %v2085_v11, %v1780_v28  ;;  %v2109_v22 = vld [vmem:[#allocation7 + $0x1d4] sm:$0xf] }
 0x16b   : > { %825 = vmatpush.bf16.msrb.mxu2 %v2733_v43  ;;  %v2750_v16 = vor.u32 %v2087_v39, %v1788_v56  ;;  %836 = vmatpush.bf16.msrb.mxu3 %v2748_v57  ;;  %v1876_v39 = vld [vmem:[#allocation7 + $0x1d8] sm:$0xf0]  ;;  %v1770_v18 = vld [vmem:[#allocation7 + $0x100] sm:$0xf]  ;;  %v2084_v14 = vld [vmem:[#allocation7 + $0x104] sm:$0xf0] }
 0x16c   : > { %853 = vmatpush.bf16.msra.mxu0 %v2738_v25  ;;  %3086 = vst [vmem:[#allocation24_spill] sm:$0xff] %v2753_v17  ;;  %v2764_v56 = vor.u32 %v2109_v22, %v1876_v39  ;;  %v2108_v63 = vld [vmem:[#allocation7 + $0x1c4] sm:$0xf0]  ;;  %v2083_v6 = vld [vmem:[#allocation7 + $0x104] sm:$0xf] }
 0x16d   : > { %3085 = vst [vmem:[#allocation23_spill] sm:$0xff] %v2750_v16  ;;  %v1772_v11 = vld [vmem:[#allocation7 + $0x108] sm:$0xf0]  ;;  %v2107_v39 = vld [vmem:[#allocation7 + $0x1c4] sm:$0xf] }
 0x16e   : > { %614 = vmatpush.bf16.msrb.mxu1 %v584_v53  ;;  %v2086_v53 = vld [vmem:[#allocation7 + $0x114] sm:$0xf0]  ;;  %3087 = vst [vmem:[#allocation25_spill] sm:$0xff] %v2762_v34  ;;  %v2774_v22 = vor.u32 %v2083_v6, %v1772_v11  ;;  %v2104_v6 = vld [vmem:[#allocation7 + $0x1a4] sm:$0xf0] }
 0x16f   : > { %826 = vmatpush.bf16.msrb.mxu2 %v2746_v44  ;;  %v2757_v4 = vor.u32 %v2086_v53, %v1778_v35  ;;  %3088 = vst [vmem:[#allocation26_spill] sm:$0xff] %v2764_v56  ;;  %837 = vmatpush.bf16.msrb.mxu3 %v2760_v32  ;;  %v1866_v35 = vld [vmem:[#allocation7 + $0x1c0] sm:$0xf]  ;;  %v2770_v53 = vor.u32 %v2084_v14, %v1770_v18  ;;  %v2106_v18 = vld [vmem:[#allocation7 + $0x1b4] sm:$0xf0] }
 0x170   : > { %854 = vmatpush.bf16.msra.mxu0 %v2750_v16  ;;  %v2772_v28 = vor.u32 %v2108_v63, %v1866_v35  ;;  %3089 = vst [vmem:[#allocation27_spill] sm:$0xff] %v2774_v22  ;;  %v2105_v14 = vld [vmem:[#allocation7 + $0x1b4] sm:$0xf]  ;;  %v1860_v35 = vld [vmem:[#allocation7 + $0x1b8] sm:$0xf0] }
 0x171   : > { %1766 = vmatmul.msk.bf16.vlgmr.msrb.gmra.mxu1 %vm291_vm0, %v2726_v60  ;;  %v2785_v63 = vor.u32 %v2105_v14, %v1860_v35  ;;  %v2103_v11 = vld [vmem:[#allocation7 + $0x1a4] sm:$0xf]  ;;  %v1844_v14 = vld [vmem:[#allocation7 + $0x198] sm:$0xf0]  ;;  %v1982_v16 = vld [vmem:[#allocation7 + $0x290] sm:$0xf] }
 0x172   : > { %863 = vmatpush.bf16.msra.mxu1 %v2721_v51  ;;  %v1852_v51 = vld [vmem:[#allocation7 + $0x1a8] sm:$0xf0]  ;;  %v2136_v25 = vld [vmem:[#allocation7 + $0x294] sm:$0xf0]  ;;  %v2135_v61 = vld [vmem:[#allocation7 + $0x294] sm:$0xf] }
 0x173   : > { %827 = vmatpush.bf16.msrb.mxu2 %v2757_v4  ;;  %838 = vmatpush.bf16.msrb.mxu3 %v2772_v28  ;;  %3091 = vst [vmem:[#allocation29_spill] sm:$0xff] %v2785_v63 }
 0x174   : > { %855 = vmatpush.bf16.msra.mxu0 %v2762_v34 }
 0x176   : > { %864 = vmatpush.bf16.msra.mxu1 %v2753_v17 }
 0x177   : > { %828 = vmatpush.bf16.msrb.mxu2 %v2770_v53 }
 0x178   : > { %856 = vmatpush.bf16.msra.mxu0 %v2774_v22  ;;  %v2101_v22 = vld [vmem:[#allocation7 + $0x194] sm:$0xf] }
 0x179   : > { %v2798_v35 = vor.u32 %v2101_v22, %v1844_v14 }
 0x17a   : > { %865 = vmatpush.bf16.msra.mxu1 %v2764_v56  ;;  %v1858_v56 = vld [vmem:[#allocation7 + $0x1b0] sm:$0xf] }
 0x17b   : > { %v2782_v60 = vor.u32 %v2106_v18, %v1858_v56  ;;  %v1842_v56 = vld [vmem:[#allocation7 + $0x190] sm:$0xf]  ;;  %v2102_v18 = vld [vmem:[#allocation7 + $0x194] sm:$0xf0]  ;;  %3093 = vst [vmem:[#allocation31_spill] sm:$0xff] %v2798_v35 }
 0x17c   : > { %932 = vmatpush.bf16.msrb.mxu0 %v2615_v21  ;;  %v2795_v21 = vor.u32 %v2102_v18, %v1842_v56 }
 0x17d   : > { %839 = vmatpush.bf16.msrb.mxu3 %v2782_v60 }
 0x180   : > { %933 = vmatpush.bf16.msrb.mxu0 %v2644_v46  ;;  %v2100_v46 = vld [vmem:[#allocation7 + $0x184] sm:$0xf0] }
 0x181   : > { %1767 = vmatmul.msk.bf16.gmra.mxu1 %vm291_vm0, %v2742_v26  ;;  %v1868_v26 = vld [vmem:[#allocation7 + $0x1c8] sm:$0xf0] }
 0x182   : > { %v2777_v17 = vor.u32 %v2107_v39, %v1868_v26  ;;  %v1850_v26 = vld [vmem:[#allocation7 + $0x1a0] sm:$0xf] }
 0x183   : > { %v2789_v39 = vor.u32 %v2104_v6, %v1850_v26  ;;  %v1834_v26 = vld [vmem:[#allocation7 + $0x180] sm:$0xf] }
 0x184   : > { %3090 = vst [vmem:[#allocation28_spill] sm:$0xff] %v2777_v17  ;;  %866 = vmatpush.bf16.msra.mxu1 %v2777_v17  ;;  %v2792_v17 = vor.u32 %v2103_v11, %v1852_v51  ;;  %934 = vmatpush.bf16.msrb.mxu0 %v2656_v58  ;;  %v2099_v51 = vld [vmem:[#allocation7 + $0x184] sm:$0xf]  ;;  %v2803_v6 = vor.u32 %v2100_v46, %v1834_v26  ;;  %v1836_v11 = vld [vmem:[#allocation7 + $0x188] sm:$0xf0] }
 0x185   : > { %840 = vmatpush.bf16.msrb.mxu3 %v2789_v39  ;;  %v2806_v56 = vor.u32 %v2099_v51, %v1836_v11 }
 0x186   : > { %3092 = vst [vmem:[#allocation30_spill] sm:$0xff] %v2792_v17 }
 0x187   : > { %3094 = vst [vmem:[#allocation32_spill] sm:$0xff] %v2806_v56 }
 0x188   : > { %867 = vmatpush.bf16.msra.mxu1 %v2785_v63  ;;  %935 = vmatpush.bf16.msrb.mxu0 %v2668_v8  ;;  %v2139_v63 = vld [vmem:[#allocation7 + $0x2b4] sm:$0xf] }
 0x189   : > { %841 = vmatpush.bf16.msrb.mxu3 %v2795_v21 }
 0x18c   : > { %868 = vmatpush.bf16.msra.mxu1 %v2792_v17  ;;  %936 = vmatpush.bf16.msrb.mxu0 %v2678_v19  ;;  %v2140_v17 = vld [vmem:[#allocation7 + $0x2b4] sm:$0xf0] }
 0x18d   : > { %842 = vmatpush.bf16.msrb.mxu3 %v2803_v6 }
 0x190   : > { %869 = vmatpush.bf16.msra.mxu1 %v2798_v35  ;;  %937 = vmatpush.bf16.msrb.mxu0 %v2684_v29  ;;  %v878_v29 = vld [vmem:[#allocation8 + $0x60] sm:$0xff]  ;;  %v1998_v35 = vld [vmem:[#allocation7 + $0x2b0] sm:$0xf] }
 0x191   : > { %918 = vmatpush.bf16.msra.mxu3 %v2600_v5 }
 0x194   : > { %870 = vmatpush.bf16.msra.mxu1 %v2806_v56  ;;  %938 = vmatpush.bf16.msrb.mxu0 %v2689_v40  ;;  %v879_v40 = vld [vmem:[#allocation8 + $0x68] sm:$0xff] }
 0x195   : > { %919 = vmatpush.bf16.msra.mxu3 %v2605_v12 }
 0x198   : > { %946 = vmatpush.bf16.msrb.mxu1 %v2602_v9  ;;  %939 = vmatpush.bf16.msrb.mxu0 %v2696_v49 }
 0x199   : > { %920 = vmatpush.bf16.msra.mxu3 %v2613_v20 }
 0x19c   : > { %947 = vmatpush.bf16.msrb.mxu1 %v2610_v13 }
 0x19d   : > { %921 = vmatpush.bf16.msra.mxu3 %v2625_v30 }
 0x1a0   : > { %948 = vmatpush.bf16.msrb.mxu1 %v2618_v24 }
 0x1a1   : > { %922 = vmatpush.bf16.msra.mxu3 %v2631_v36 }
 0x1a4   : > { %949 = vmatpush.bf16.msrb.mxu1 %v2628_v31 }
 0x1a5   : > { %923 = vmatpush.bf16.msra.mxu3 %v2642_v42 }
 0x1a8   : > { %950 = vmatpush.bf16.msrb.mxu1 %v2636_v38 }
 0x1a9   : > { %924 = vmatpush.bf16.msra.mxu3 %v2653_v54 }
 0x1ac   : > { %951 = vmatpush.bf16.msrb.mxu1 %v2646_v47 }
 0x1ad   : > { %925 = vmatpush.bf16.msra.mxu3 %v2666_v3 }
 0x1b0   : > { %952 = vmatpush.bf16.msrb.mxu1 %v2658_v59  ;;  %v881_v59 = vld [vmem:[#allocation8 + $0x70] sm:$0xff] }
 0x1b4   : > { %953 = vmatpush.bf16.msrb.mxu1 %v2670_v10  ;;  %v882_v10 = vld [vmem:[#allocation8 + $0x78] sm:$0xff] }
 0x1ee   : > { %v616_v58 = vpop.f32.mrf.mxu1 }
 0x1f6   : > { %v618_v5 = vpop.f32.mrf.mxu1 }
 0x1f7   : > { %v626_v9 = vpack.c.bf16 %v618_v5, %v616_v58 }
 0x1f9   : > { %829 = vmatmul.bf16.vlgmr.msrb.gmra.mxu2 %v626_v9  ;;  %857 = vmatmul.bf16.vlgmr.msra.gmra.mxu0 %v626_v9 }
 0x1fe   : > { %v621_v12 = vpop.f32.mrf.mxu1 }
 0x206   : > { %v623_v13 = vpop.f32.mrf.mxu1 }
 0x207   : > { %v627_v20 = vpack.c.bf16 %v623_v13, %v621_v12 }
 0x209   : > { %843 = vmatmul.bf16.vlgmr.msrb.gmra.mxu3 %v627_v20  ;;  %871 = vmatmul.bf16.vlgmr.msra.gmra.mxu1 %v627_v20 }
 0x276   : > { %v858_v30 = vpop.f32.mrf.mxu0 }
 0x27c   : > { %v830_v31 = vpop.f32.mrf.mxu2 }
 0x27e   : > { %v860_v8 = vpop.f32.mrf.mxu0 }
 0x284   : > { %v832_v54 = vpop.f32.mrf.mxu2 }
 0x286   : > { %v872_v24 = vpop.f32.mrf.mxu1 }
 0x287   : > { %v873_v47 = vadd.f32 %v872_v24, %v858_v30  ;;  %v3095_v30 = vld [vmem:[#allocation15_spill] sm:$0xff] }
 0x289   : > { %v891_v18 = vmul.f32 %v878_v29, %v873_v47  ;;  %v885_v9 = vmul.f32 %v881_v59, %v873_v47 }
 0x28c   : > { %v844_v36 = vpop.f32.mrf.mxu3 }
 0x28d   : > { %v845_v42 = vadd.f32 %v844_v36, %v830_v31  ;;  %v3096_v31 = vld [vmem:[#allocation16_spill] sm:$0xff] }
 0x28e   : > { %v874_v38 = vpop.f32.mrf.mxu1 }
 0x28f   : > { %v875_v19 = vadd.f32 %v874_v38, %v860_v8  ;;  %v889_v49 = vmul.f32 %v881_v59, %v845_v42  ;;  %v883_v51 = vmul.f32 %v878_v29, %v845_v42  ;;  %v2844_v29 = vld [vmem:[#allocation8 + $0x30] sm:$0xff] }
 0x291   : > { %v892_v14 = vmul.f32 %v879_v40, %v875_v19  ;;  %v893_v11 = vadd.f32 %v891_v18, %v889_v49  ;;  %v886_v58 = vmul.f32 %v882_v10, %v875_v19  ;;  %v887_v20 = vsub.f32 %v883_v51, %v885_v9  ;;  %v2131_v18 = vld [vmem:[#allocation7 + $0x274] sm:$0xf]  ;;  %v1968_v51 = vld [vmem:[#allocation7 + $0x278] sm:$0xf0]  ;;  %v2852_v9 = vld [vmem:[#allocation8 + $0x28] sm:$0xff] }
 0x294   : > { %v846_v3 = vpop.f32.mrf.mxu3 }
 0x295   : > { %v847_v22 = vadd.f32 %v846_v3, %v832_v54  ;;  %v2842_v54 = vld [vmem:[#allocation8 + $0x20] sm:$0xff] }
 0x297   : > { %v884_v26 = vmul.f32 %v879_v40, %v847_v22  ;;  %v890_v46 = vmul.f32 %v882_v10, %v847_v22  ;;  %v2846_v40 = vld [vmem:[#allocation8 + $0x38] sm:$0xff]  ;;  %v1966_v22 = vld [vmem:[#allocation7 + $0x270] sm:$0xf] }
 0x298   : > { %v2132_v10 = vld [vmem:[#allocation7 + $0x274] sm:$0xf0] }
 0x299   : > { %v894_v5 = vadd.f32 %v892_v14, %v890_v46  ;;  %v888_v12 = vsub.f32 %v884_v26, %v886_v58  ;;  %v2849_v46 = vor.u32 %v2132_v10, %v1966_v22  ;;  %v2130_v58 = vld [vmem:[#allocation7 + $0x264] sm:$0xf0] }
 0x29b   : > { %v896_v13 = vpack.c.bf16 %v894_v5, %v893_v11  ;;  %v895_v24 = vpack.c.bf16 %v888_v12, %v887_v20  ;;  %v1958_v11 = vld [vmem:[#allocation7 + $0x260] sm:$0xf]  ;;  %v2854_v12 = vor.u32 %v2131_v18, %v1968_v51  ;;  %v1960_v20 = vld [vmem:[#allocation7 + $0x268] sm:$0xf0]  ;;  %1229 = vmatpush.bf16.msra.mxu0 %v2849_v46  ;;  %v2126_v51 = vld [vmem:[#allocation7 + $0x244] sm:$0xf0] }
 0x29d   : > { %903 = vmatpush.bf16.msra.mxu2 %v896_v13  ;;  %v2129_v13 = vld [vmem:[#allocation7 + $0x264] sm:$0xf] }
 0x2a1   : > { %904 = vmatpush.bf16.msra.mxu2 %v895_v24 }
 0x2a4   : > { %1896 = vmatmul.msk.bf16.vlgmr.msra.gmra.mxu2 %vm291_vm0, %v2598_v1 }
 0x2a5   : > { %960 = vmatpush.bf16.msrb.mxu2 %v2620_v27 }
 0x2a9   : > { %961 = vmatpush.bf16.msrb.mxu2 %v2649_v50 }
 0x2ad   : > { %962 = vmatpush.bf16.msrb.mxu2 %v2660_v62 }
 0x2b1   : > { %963 = vmatpush.bf16.msrb.mxu2 %v2673_v15 }
 0x2b4   : > { %1897 = vmatmul.msk.bf16.gmra.mxu2 %vm291_vm0, %v2633_v37 }
 0x2b5   : > { %964 = vmatpush.bf16.msrb.mxu2 %v2680_v23 }
 0x2b9   : > { %965 = vmatpush.bf16.msrb.mxu2 %v2686_v33 }
 0x2bd   : > { %966 = vmatpush.bf16.msrb.mxu2 %v3095_v30 }
 0x2c1   : > { %967 = vmatpush.bf16.msrb.mxu2 %v3096_v31 }
 0x2c5   : > { %1257 = vmatpush.bf16.msra.mxu2 %v2854_v12 }
 0x327   : > { %v906_v27 = vpop.f32.mrf.mxu2 }
 0x32f   : > { %v908_v36 = vpop.f32.mrf.mxu2 }
 0x330   : > { %v916_v1 = vpack.c.bf16 %v908_v36, %v906_v27  ;;  %v2860_v27 = vor.u32 %v2130_v58, %v1958_v11  ;;  %v2863_v36 = vor.u32 %v2129_v13, %v1960_v20  ;;  %v1944_v58 = vld [vmem:[#allocation7 + $0x248] sm:$0xf0] }
 0x332   : > { %926 = vmatmul.bf16.vlgmr.msra.gmra.mxu3 %v916_v1  ;;  %954 = vmatmul.bf16.vlgmr.msrb.gmra.mxu1 %v916_v1  ;;  %v1950_v1 = vld [vmem:[#allocation7 + $0x250] sm:$0xf] }
 0x333   : > { %1230 = vmatpush.bf16.msra.mxu0 %v2860_v27  ;;  %1258 = vmatpush.bf16.msra.mxu2 %v2863_v36 }
 0x337   : > { %v911_v50 = vpop.f32.mrf.mxu2 }
 0x33f   : > { %v913_v62 = vpop.f32.mrf.mxu2 }
 0x340   : > { %v917_v38 = vpack.c.bf16 %v913_v62, %v911_v50  ;;  %v2128_v50 = vld [vmem:[#allocation7 + $0x254] sm:$0xf0] }
 0x341   : > { %v2869_v10 = vor.u32 %v2128_v50, %v1950_v1  ;;  %v2124_v1 = vld [vmem:[#allocation7 + $0x234] sm:$0xf0]  ;;  %v2123_v50 = vld [vmem:[#allocation7 + $0x234] sm:$0xf] }
 0x342   : > { %940 = vmatmul.bf16.vlgmr.msrb.gmra.mxu0 %v917_v38  ;;  %968 = vmatmul.bf16.vlgmr.msrb.gmra.mxu2 %v917_v38 }
 0x343   : > { %1231 = vmatpush.bf16.msra.mxu0 %v2869_v10 }
 0x3af   : > { %v955_v42 = vpop.f32.mrf.mxu1 }
 0x3b5   : > { %v927_v23 = vpop.f32.mrf.mxu3 }
 0x3b7   : > { %v957_v3 = vpop.f32.mrf.mxu1 }
 0x3bd   : > { %v929_v47 = vpop.f32.mrf.mxu3 }
 0x3bf   : > { %v941_v15 = vpop.f32.mrf.mxu0 }
 0x3c0   : > { %v942_v19 = vadd.f32 %v941_v15, %v927_v23 }
 0x3c2   : > { %v986_v5 = vmul.f32 %v2844_v29, %v942_v19 }
 0x3c5   : > { %v969_v37 = vpop.f32.mrf.mxu2 }
 0x3c6   : > { %v970_v33 = vadd.f32 %v969_v37, %v955_v42  ;;  %v2127_v42 = vld [vmem:[#allocation7 + $0x254] sm:$0xf]  ;;  %v1952_v37 = vld [vmem:[#allocation7 + $0x258] sm:$0xf0] }
 0x3c7   : > { %v943_v8 = vpop.f32.mrf.mxu0 }
 0x3c8   : > { %v944_v59 = vadd.f32 %v943_v8, %v929_v47  ;;  %v988_v14 = vmul.f32 %v2842_v54, %v970_v33  ;;  %v982_v62 = vmul.f32 %v2844_v29, %v970_v33  ;;  %v980_v8 = vmul.f32 %v2842_v54, %v942_v19  ;;  %v2030_v47 = vld [vmem:[#allocation7 + $0x2f0] sm:$0xf]  ;;  %v2032_v33 = vld [vmem:[#allocation7 + $0x2f8] sm:$0xf0]  ;;  %v2125_v19 = vld [vmem:[#allocation7 + $0x244] sm:$0xf] }
 0x3ca   : > { %v987_v24 = vmul.f32 %v2846_v40, %v944_v59  ;;  %v990_v38 = vadd.f32 %v988_v14, %v986_v5  ;;  %v981_v15 = vmul.f32 %v2852_v9, %v944_v59  ;;  %v2874_v59 = vor.u32 %v2127_v42, %v1952_v37  ;;  %v1942_v14 = vld [vmem:[#allocation7 + $0x240] sm:$0xf]  ;;  %v2122_v37 = vld [vmem:[#allocation7 + $0x224] sm:$0xf0] }
 0x3cb   : > { %v984_v11 = vsub.f32 %v980_v8, %v982_v62  ;;  %v2880_v20 = vor.u32 %v2126_v51, %v1942_v14  ;;  %v1936_v62 = vld [vmem:[#allocation7 + $0x238] sm:$0xf0]  ;;  %v1926_v42 = vld [vmem:[#allocation7 + $0x220] sm:$0xf]  ;;  %v2145_v14 = vld [vmem:[#allocation7 + $0x2e4] sm:$0xf] }
 0x3cc   : > { %1259 = vmatpush.bf16.msra.mxu2 %v2874_v59  ;;  %v2022_v8 = vld [vmem:[#allocation7 + $0x2e0] sm:$0xf]  ;;  %v2024_v51 = vld [vmem:[#allocation7 + $0x2e8] sm:$0xf0] }
 0x3cd   : > { %v971_v49 = vpop.f32.mrf.mxu2  ;;  %1232 = vmatpush.bf16.msra.mxu0 %v2880_v20 }
 0x3ce   : > { %v972_v26 = vadd.f32 %v971_v49, %v957_v3  ;;  %v2148_v3 = vld [vmem:[#allocation7 + $0x2f4] sm:$0xf0] }
 0x3cf   : > { %v2871_v18 = vor.u32 %v2148_v3, %v2030_v47  ;;  %v2902_v47 = vor.u32 %v2122_v37, %v1926_v42  ;;  %v2146_v3 = vld [vmem:[#allocation7 + $0x2e4] sm:$0xf0] }
 0x3d0   : > { %v983_v30 = vmul.f32 %v2846_v40, %v972_v26  ;;  %v989_v31 = vmul.f32 %v2852_v9, %v972_v26  ;;  %v2147_v26 = vld [vmem:[#allocation7 + $0x2f4] sm:$0xf] }
 0x3d1   : > { %1243 = vmatpush.bf16.msra.mxu1 %v2871_v18  ;;  %v2877_v5 = vor.u32 %v2147_v26, %v2032_v33  ;;  %v2023_v26 = vor.u32 %v2146_v3, %v2022_v8  ;;  %v2143_v8 = vld [vmem:[#allocation7 + $0x2d4] sm:$0xf]  ;;  %v2016_v3 = vld [vmem:[#allocation7 + $0x2d8] sm:$0xf0] }
 0x3d2   : > { %v991_v23 = vadd.f32 %v989_v31, %v987_v24  ;;  %v985_v49 = vsub.f32 %v981_v15, %v983_v30  ;;  %v2882_v24 = vld [vmem:[#allocation5 + $0x20] sm:$0xff]  ;;  %v2885_v30 = vor.u32 %v2125_v19, %v1944_v58  ;;  %v2894_v15 = vor.u32 %v2123_v50, %v1936_v62  ;;  %v2120_v58 = vld [vmem:[#allocation7 + $0x214] sm:$0xf0]  ;;  %v1920_v62 = vld [vmem:[#allocation7 + $0x218] sm:$0xf0] }
 0x3d3   : > { %v1934_v31 = vld [vmem:[#allocation7 + $0x230] sm:$0xf]  ;;  %v2119_v50 = vld [vmem:[#allocation7 + $0x214] sm:$0xf] }
 0x3d4   : > { %v993_v22 = vpack.c.bf16 %v991_v23, %v990_v38  ;;  %v992_v13 = vpack.c.bf16 %v985_v49, %v984_v11  ;;  %v2889_v38 = vor.u32 %v2124_v1, %v1934_v31  ;;  %1260 = vmatpush.bf16.msra.mxu2 %v2885_v30  ;;  %v2898_v23 = vld [vmem:[#allocation5 + $0x28] sm:$0xff]  ;;  %v2121_v49 = vld [vmem:[#allocation7 + $0x224] sm:$0xf]  ;;  %v2907_v11 = vor.u32 %v2145_v14, %v2024_v51  ;;  %v1918_v19 = vld [vmem:[#allocation7 + $0x210] sm:$0xf] }
 0x3d5   : > { %1244 = vmatpush.bf16.msra.mxu1 %v2023_v26  ;;  %v2910_v31 = vor.u32 %v2120_v58, %v1918_v19  ;;  %v2144_v1 = vld [vmem:[#allocation7 + $0x2d4] sm:$0xf0]  ;;  %v2913_v37 = vor.u32 %v2119_v50, %v1920_v62  ;;  %v2118_v14 = vld [vmem:[#allocation7 + $0x204] sm:$0xf0]  ;;  %v2006_v51 = vld [vmem:[#allocation7 + $0x2c0] sm:$0xf] }
 0x3d6   : > { %1021 = vmatpush.bf16.msrb.mxu3 %v993_v22  ;;  %1233 = vmatpush.bf16.msra.mxu0 %v2889_v38  ;;  %v1928_v22 = vld [vmem:[#allocation7 + $0x228] sm:$0xf0]  ;;  %v2142_v58 = vld [vmem:[#allocation7 + $0x2c4] sm:$0xf0] }
 0x3d7   : > { %v2904_v33 = vor.u32 %v2121_v49, %v1928_v22  ;;  %v2915_v49 = vor.u32 %v2143_v8, %v2016_v3  ;;  %v1910_v22 = vld [vmem:[#allocation7 + $0x200] sm:$0xf]  ;;  %v2007_v50 = vor.u32 %v2142_v58, %v2006_v51  ;;  %v2141_v8 = vld [vmem:[#allocation7 + $0x2c4] sm:$0xf]  ;;  %v2008_v3 = vld [vmem:[#allocation7 + $0x2c8] sm:$0xf0] }
 0x3d8   : > { %1261 = vmatpush.bf16.msra.mxu2 %v2894_v15  ;;  %v2920_v19 = vor.u32 %v2118_v14, %v1910_v22  ;;  %v2925_v56 = vor.u32 %v2141_v8, %v2008_v3  ;;  %v1999_v22 = vor.u32 %v2140_v17, %v1998_v35  ;;  %v2000_v14 = vld [vmem:[#allocation7 + $0x2b8] sm:$0xf0]  ;;  %v1990_v58 = vld [vmem:[#allocation7 + $0x2a0] sm:$0xf]  ;;  %v1992_v3 = vld [vmem:[#allocation7 + $0x2a8] sm:$0xf0]  ;;  %v1983_v17 = vor.u32 %v2136_v25, %v1982_v16 }
 0x3d9   : > { %v2930_v51 = vor.u32 %v2139_v63, %v2000_v14  ;;  %v1984_v35 = vld [vmem:[#allocation7 + $0x298] sm:$0xf0]  ;;  %v2134_v14 = vld [vmem:[#allocation7 + $0x284] sm:$0xf0] }
 0x3da   : > { %1022 = vmatpush.bf16.msrb.mxu3 %v992_v13  ;;  %1234 = vmatpush.bf16.msra.mxu0 %v2902_v47  ;;  %v2014_v13 = vld [vmem:[#allocation7 + $0x2d0] sm:$0xf]  ;;  %v2936_v63 = vor.u32 %v2135_v61, %v1984_v35 }
 0x3db   : > { %v2015_v42 = vor.u32 %v2144_v1, %v2014_v13  ;;  %v2117_v13 = vld [vmem:[#allocation7 + $0x204] sm:$0xf]  ;;  %v1912_v1 = vld [vmem:[#allocation7 + $0x208] sm:$0xf0] }
 0x3dc   : > { %1262 = vmatpush.bf16.msra.mxu2 %v2904_v33  ;;  %v2922_v62 = vor.u32 %v2117_v13, %v1912_v1  ;;  %v2138_v13 = vld [vmem:[#allocation7 + $0x2a4] sm:$0xf0]  ;;  %v2137_v1 = vld [vmem:[#allocation7 + $0x2a4] sm:$0xf] }
 0x3dd   : > { %1906 = vmatmul.msk.bf16.vlgmr.msrb.gmra.mxu3 %vm291_vm0, %v2882_v24  ;;  %1245 = vmatpush.bf16.msra.mxu1 %v2015_v42  ;;  %v1991_v8 = vor.u32 %v2138_v13, %v1990_v58  ;;  %v2933_v34 = vor.u32 %v2137_v1, %v1992_v3  ;;  %v1976_v58 = vld [vmem:[#allocation7 + $0x288] sm:$0xf0]  ;;  %v1380_v3 = vld [vmem:[#allocation8 + $0x50] sm:$0xff] }
 0x3de   : > { %1271 = vmatpush.bf16.msra.mxu3 %v2877_v5  ;;  %1235 = vmatpush.bf16.msra.mxu0 %v2910_v31  ;;  %v2939_v13 = vor.u32 %v2133_v7, %v1976_v58 }
 0x3e0   : > { %1263 = vmatpush.bf16.msra.mxu2 %v2913_v37 }
 0x3e1   : > { %1246 = vmatpush.bf16.msra.mxu1 %v2007_v50 }
 0x3e2   : > { %1272 = vmatpush.bf16.msra.mxu3 %v2907_v11  ;;  %1236 = vmatpush.bf16.msra.mxu0 %v2920_v19 }
 0x3e4   : > { %1264 = vmatpush.bf16.msra.mxu2 %v2922_v62 }
 0x3e5   : > { %1247 = vmatpush.bf16.msra.mxu1 %v1999_v22 }
 0x3e6   : > { %1273 = vmatpush.bf16.msra.mxu3 %v2915_v49 }
 0x3e8   : > { %1334 = vmatpush.bf16.msrb.mxu2 %v2871_v18  ;;  %v1974_v18 = vld [vmem:[#allocation7 + $0x280] sm:$0xf] }
 0x3e9   : > { %1248 = vmatpush.bf16.msra.mxu1 %v1991_v8 }
 0x3ea   : > { %1274 = vmatpush.bf16.msra.mxu3 %v2925_v56 }
 0x3ec   : > { %1335 = vmatpush.bf16.msrb.mxu2 %v2023_v26  ;;  %v1975_v26 = vor.u32 %v2134_v14, %v1974_v18  ;;  %v1381_v14 = vld [vmem:[#allocation8 + $0x58] sm:$0xff] }
 0x3ed   : > { %1907 = vmatmul.msk.bf16.gmra.mxu3 %vm291_vm0, %v2898_v23  ;;  %1249 = vmatpush.bf16.msra.mxu1 %v1983_v17 }
 0x3ee   : > { %1275 = vmatpush.bf16.msra.mxu3 %v2930_v51 }
 0x3f0   : > { %1336 = vmatpush.bf16.msrb.mxu2 %v2015_v42 }
 0x3f1   : > { %1250 = vmatpush.bf16.msra.mxu1 %v1975_v26 }
 0x3f2   : > { %1276 = vmatpush.bf16.msra.mxu3 %v2933_v34 }
 0x3f4   : > { %1337 = vmatpush.bf16.msrb.mxu2 %v2007_v50 }
 0x3f5   : > { %1320 = vmatpush.bf16.msrb.mxu1 %v2849_v46 }
 0x3f6   : > { %1277 = vmatpush.bf16.msra.mxu3 %v2936_v63 }
 0x3f8   : > { %1338 = vmatpush.bf16.msrb.mxu2 %v1999_v22 }
 0x3f9   : > { %1321 = vmatpush.bf16.msrb.mxu1 %v2860_v27 }
 0x3fa   : > { %1278 = vmatpush.bf16.msra.mxu3 %v2939_v13 }
 0x3fc   : > { %1339 = vmatpush.bf16.msrb.mxu2 %v1991_v8  ;;  %v1377_v8 = vld [vmem:[#allocation8 + $0x40] sm:$0xff] }
 0x3fd   : > { %1322 = vmatpush.bf16.msrb.mxu1 %v2869_v10 }
 0x3fe   : > { %1348 = vmatpush.bf16.msrb.mxu3 %v2854_v12 }
 0x400   : > { %1340 = vmatpush.bf16.msrb.mxu2 %v1983_v17  ;;  %v1378_v17 = vld [vmem:[#allocation8 + $0x48] sm:$0xff] }
 0x401   : > { %1323 = vmatpush.bf16.msrb.mxu1 %v2880_v20 }
 0x402   : > { %1349 = vmatpush.bf16.msrb.mxu3 %v2863_v36 }
 0x404   : > { %1341 = vmatpush.bf16.msrb.mxu2 %v1975_v26 }
 0x405   : > { %1324 = vmatpush.bf16.msrb.mxu1 %v2889_v38 }
 0x406   : > { %1350 = vmatpush.bf16.msrb.mxu3 %v2874_v59 }
 0x409   : > { %1325 = vmatpush.bf16.msrb.mxu1 %v2902_v47 }
 0x40a   : > { %1351 = vmatpush.bf16.msrb.mxu3 %v2885_v30 }
 0x40d   : > { %1326 = vmatpush.bf16.msrb.mxu1 %v2910_v31 }
 0x40e   : > { %1352 = vmatpush.bf16.msrb.mxu3 %v2894_v15 }
 0x411   : > { %1327 = vmatpush.bf16.msrb.mxu1 %v2920_v19 }
 0x412   : > { %1353 = vmatpush.bf16.msrb.mxu3 %v2904_v33 }
 0x416   : > { %1354 = vmatpush.bf16.msrb.mxu3 %v2913_v37 }
 0x41a   : > { %1355 = vmatpush.bf16.msrb.mxu3 %v2922_v62 }
 0x460   : > { %v1024_v61 = vpop.f32.mrf.mxu3 }
 0x468   : > { %v1026_v7 = vpop.f32.mrf.mxu3 }
 0x469   : > { %v1034_v25 = vpack.c.bf16 %v1026_v7, %v1024_v61 }
 0x46b   : > { %1237 = vmatmul.bf16.vlgmr.msra.gmra.mxu0 %v1034_v25  ;;  %1265 = vmatmul.bf16.vlgmr.msra.gmra.mxu2 %v1034_v25 }
 0x46c   : > { %1417 = vmatpush.bf16.msra.mxu2 %v2702_v41 }
 0x470   : > { %v1029_v16 = vpop.f32.mrf.mxu3  ;;  %1418 = vmatpush.bf16.msra.mxu2 %v2707_v0 }
 0x474   : > { %1419 = vmatpush.bf16.msra.mxu2 %v2713_v45 }
 0x478   : > { %v1031_v46 = vpop.f32.mrf.mxu3  ;;  %1420 = vmatpush.bf16.msra.mxu2 %v2724_v52 }
 0x479   : > { %v1035_v41 = vpack.c.bf16 %v1031_v46, %v1029_v16 }
 0x47b   : > { %1251 = vmatmul.bf16.vlgmr.msra.gmra.mxu1 %v1035_v41  ;;  %1279 = vmatmul.bf16.vlgmr.msra.gmra.mxu3 %v1035_v41 }
 0x47c   : > { %1421 = vmatpush.bf16.msra.mxu2 %v2733_v43  ;;  %1431 = vmatpush.bf16.msra.mxu3 %v2715_v48 }
 0x480   : > { %1422 = vmatpush.bf16.msra.mxu2 %v2746_v44  ;;  %1432 = vmatpush.bf16.msra.mxu3 %v2748_v57 }
 0x484   : > { %1423 = vmatpush.bf16.msra.mxu2 %v2757_v4  ;;  %1433 = vmatpush.bf16.msra.mxu3 %v2760_v32 }
 0x488   : > { %1424 = vmatpush.bf16.msra.mxu2 %v2770_v53  ;;  %1434 = vmatpush.bf16.msra.mxu3 %v2772_v28 }
 0x48c   : > { %1435 = vmatpush.bf16.msra.mxu3 %v2782_v60 }
 0x490   : > { %1436 = vmatpush.bf16.msra.mxu3 %v2789_v39 }
 0x494   : > { %1437 = vmatpush.bf16.msra.mxu3 %v2795_v21 }
 0x498   : > { %1438 = vmatpush.bf16.msra.mxu3 %v2803_v6 }
 0x4e8   : > { %v1238_v45 = vpop.f32.mrf.mxu0 }
 0x4ee   : > { %v1266_v48 = vpop.f32.mrf.mxu2 }
 0x4f0   : > { %v1240_v57 = vpop.f32.mrf.mxu0 }
 0x4f6   : > { %v1268_v53 = vpop.f32.mrf.mxu2 }
 0x4f8   : > { %v1252_v0 = vpop.f32.mrf.mxu1 }
 0x4f9   : > { %v1253_v4 = vadd.f32 %v1252_v0, %v1238_v45 }
 0x4fb   : > { %v1291_v39 = vmul.f32 %v1253_v4, %v2844_v29  ;;  %v1285_v30 = vmul.f32 %v1253_v4, %v2842_v54  ;;  %v3106_v4 = vld [vmem:[#allocation26_spill] sm:$0xff] }
 0x4fe   : > { %v1280_v52 = vpop.f32.mrf.mxu3 }
 0x4ff   : > { %v1281_v44 = vadd.f32 %v1280_v52, %v1266_v48 }
 0x500   : > { %v1254_v43 = vpop.f32.mrf.mxu1 }
 0x501   : > { %v1255_v32 = vadd.f32 %v1254_v43, %v1240_v57  ;;  %v1293_v28 = vmul.f32 %v1281_v44, %v2842_v54  ;;  %v1287_v36 = vmul.f32 %v1281_v44, %v2844_v29  ;;  %v3097_v54 = vld [vmem:[#allocation17_spill] sm:$0xff]  ;;  %v3098_v29 = vld [vmem:[#allocation20_spill] sm:$0xff]  ;;  %v3103_v43 = vld [vmem:[#allocation18_spill] sm:$0xff] }
 0x502   : > { %v3104_v44 = vld [vmem:[#allocation19_spill] sm:$0xff]  ;;  %v3105_v57 = vld [vmem:[#allocation24_spill] sm:$0xff] }
 0x503   : > { %v1292_v21 = vmul.f32 %v1255_v32, %v2846_v40  ;;  %v1295_v10 = vadd.f32 %v1293_v28, %v1291_v39  ;;  %v1286_v59 = vmul.f32 %v1255_v32, %v2852_v9  ;;  %v1289_v47 = vsub.f32 %v1285_v30, %v1287_v36  ;;  %v3107_v32 = vld [vmem:[#allocation28_spill] sm:$0xff]  ;;  %v3110_v28 = vld [vmem:[#allocation30_spill] sm:$0xff] }
 0x504   : > { %v3112_v39 = vld [vmem:[#allocation32_spill] sm:$0xff] }
 0x506   : > { %v1282_v12 = vpop.f32.mrf.mxu3 }
 0x507   : > { %v1283_v60 = vadd.f32 %v1282_v12, %v1268_v53  ;;  %v3108_v53 = vld [vmem:[#allocation29_spill] sm:$0xff]  ;;  %v3109_v12 = vld [vmem:[#allocation22_spill] sm:$0xff] }
 0x509   : > { %v1288_v6 = vmul.f32 %v1283_v60, %v2846_v40  ;;  %v1294_v27 = vmul.f32 %v1283_v60, %v2852_v9  ;;  %v3100_v40 = vld [vmem:[#allocation23_spill] sm:$0xff]  ;;  %v3101_v9 = vld [vmem:[#allocation25_spill] sm:$0xff] }
 0x50a   : > { %v3111_v60 = vld [vmem:[#allocation31_spill] sm:$0xff] }
 0x50b   : > { %v1296_v20 = vadd.f32 %v1294_v27, %v1292_v21  ;;  %v1290_v38 = vsub.f32 %v1286_v59, %v1288_v6 }
 0x50d   : > { %v1298_v15 = vpack.c.bf16 %v1296_v20, %v1295_v10  ;;  %v1297_v33 = vpack.c.bf16 %v1290_v38, %v1289_v47 }
 0x50f   : > { %1305 = vmatpush.bf16.msrb.mxu0 %v1298_v15 }
 0x513   : > { %1306 = vmatpush.bf16.msrb.mxu0 %v1297_v33 }
 0x516   : > { %2036 = vmatmul.msk.bf16.vlgmr.msrb.gmra.mxu0 %vm291_vm0, %v2882_v24 }
 0x517   : > { %1362 = vmatpush.bf16.msra.mxu0 %v2877_v5  ;;  %v3102_v5 = vld [vmem:[#allocation27_spill] sm:$0xff] }
 0x51b   : > { %1363 = vmatpush.bf16.msra.mxu0 %v2907_v11 }
 0x51f   : > { %1364 = vmatpush.bf16.msra.mxu0 %v2915_v49 }
 0x523   : > { %1365 = vmatpush.bf16.msra.mxu0 %v2925_v56  ;;  %v3099_v56 = vld [vmem:[#allocation21_spill] sm:$0xff] }
 0x526   : > { %2037 = vmatmul.msk.bf16.gmra.mxu0 %vm291_vm0, %v2898_v23 }
 0x527   : > { %1366 = vmatpush.bf16.msra.mxu0 %v2930_v51 }
 0x52b   : > { %1367 = vmatpush.bf16.msra.mxu0 %v2933_v34 }
 0x52f   : > { %1368 = vmatpush.bf16.msra.mxu0 %v2936_v63 }
 0x533   : > { %1369 = vmatpush.bf16.msra.mxu0 %v2939_v13 }
 0x537   : > { %1445 = vmatpush.bf16.msrb.mxu0 %v2704_v55 }
 0x53b   : > { %1446 = vmatpush.bf16.msrb.mxu0 %v2710_v2 }
 0x53f   : > { %1447 = vmatpush.bf16.msrb.mxu0 %v3097_v54 }
 0x543   : > { %1448 = vmatpush.bf16.msrb.mxu0 %v3098_v29 }
 0x547   : > { %1449 = vmatpush.bf16.msrb.mxu0 %v3099_v56 }
 0x54b   : > { %1450 = vmatpush.bf16.msrb.mxu0 %v3100_v40 }
 0x54f   : > { %1451 = vmatpush.bf16.msrb.mxu0 %v3101_v9 }
 0x553   : > { %1452 = vmatpush.bf16.msrb.mxu0 %v3102_v5 }
 0x593   : > { %v1308_v34 = vpop.f32.mrf.mxu0 }
 0x59b   : > { %v1310_v24 = vpop.f32.mrf.mxu0 }
 0x59c   : > { %v1318_v23 = vpack.c.bf16 %v1310_v24, %v1308_v34 }
 0x59e   : > { %1328 = vmatmul.bf16.vlgmr.msrb.gmra.mxu1 %v1318_v23  ;;  %1356 = vmatmul.bf16.vlgmr.msrb.gmra.mxu3 %v1318_v23 }
 0x5a3   : > { %v1313_v55 = vpop.f32.mrf.mxu0 }
 0x5ab   : > { %v1315_v11 = vpop.f32.mrf.mxu0 }
 0x5ac   : > { %v1319_v2 = vpack.c.bf16 %v1315_v11, %v1313_v55 }
 0x5ae   : > { %1342 = vmatmul.bf16.vlgmr.msrb.gmra.mxu2 %v1319_v2  ;;  %1370 = vmatmul.bf16.vlgmr.msra.gmra.mxu0 %v1319_v2 }
 0x61b   : > { %v1329_v37 = vpop.f32.mrf.mxu1 }
 0x621   : > { %v1357_v42 = vpop.f32.mrf.mxu3 }
 0x623   : > { %v1331_v1 = vpop.f32.mrf.mxu1 }
 0x629   : > { %v1359_v62 = vpop.f32.mrf.mxu3 }
 0x62b   : > { %v1371_v31 = vpop.f32.mrf.mxu0 }
 0x62c   : > { %v1372_v22 = vadd.f32 %v1371_v31, %v1357_v42 }
 0x62e   : > { %v1390_v26 = vmul.f32 %v1377_v8, %v1372_v22  ;;  %v1384_v41 = vmul.f32 %v1380_v3, %v1372_v22 }
 0x631   : > { %v1343_v49 = vpop.f32.mrf.mxu2 }
 0x632   : > { %v1344_v50 = vadd.f32 %v1343_v49, %v1329_v37 }
 0x633   : > { %v1373_v19 = vpop.f32.mrf.mxu0 }
 0x634   : > { %v1374_v51 = vadd.f32 %v1373_v19, %v1359_v62  ;;  %v1388_v63 = vmul.f32 %v1380_v3, %v1344_v50  ;;  %v1382_v7 = vmul.f32 %v1377_v8, %v1344_v50 }
 0x636   : > { %v1391_v58 = vmul.f32 %v1378_v17, %v1374_v51  ;;  %v1392_v25 = vadd.f32 %v1390_v26, %v1388_v63  ;;  %v1385_v16 = vmul.f32 %v1381_v14, %v1374_v51  ;;  %v1386_v48 = vsub.f32 %v1382_v7, %v1384_v41 }
 0x639   : > { %v1345_v35 = vpop.f32.mrf.mxu2 }
 0x63a   : > { %v1346_v18 = vadd.f32 %v1345_v35, %v1331_v1 }
 0x63c   : > { %v1383_v13 = vmul.f32 %v1378_v17, %v1346_v18  ;;  %v1389_v61 = vmul.f32 %v1381_v14, %v1346_v18 }
 0x63e   : > { %v1393_v46 = vadd.f32 %v1391_v58, %v1389_v61  ;;  %v1387_v0 = vsub.f32 %v1383_v13, %v1385_v16 }
 0x640   : > { %v1395_v45 = vpack.c.bf16 %v1393_v46, %v1392_v25  ;;  %v1394_v52 = vpack.c.bf16 %v1387_v0, %v1386_v48 }
 0x642   : > { %1402 = vmatpush.bf16.msra.mxu1 %v1395_v45 }
 0x646   : > { %1403 = vmatpush.bf16.msra.mxu1 %v1394_v52 }
 0x649   : > { %2038 = vmatmul.msk.bf16.vlgmr.msra.gmra.mxu1 %vm291_vm0, %v3104_v44 }
 0x64a   : > { %1459 = vmatpush.bf16.msrb.mxu1 %v3103_v43 }
 0x64e   : > { %1460 = vmatpush.bf16.msrb.mxu1 %v3105_v57 }
 0x652   : > { %1461 = vmatpush.bf16.msrb.mxu1 %v3106_v4 }
 0x656   : > { %1462 = vmatpush.bf16.msrb.mxu1 %v3107_v32 }
 0x659   : > { %2039 = vmatmul.msk.bf16.gmra.mxu1 %vm291_vm0, %v3109_v12 }
 0x65a   : > { %1463 = vmatpush.bf16.msrb.mxu1 %v3108_v53 }
 0x65e   : > { %1464 = vmatpush.bf16.msrb.mxu1 %v3110_v28 }
 0x662   : > { %1465 = vmatpush.bf16.msrb.mxu1 %v3111_v60 }
 0x666   : > { %1466 = vmatpush.bf16.msrb.mxu1 %v3112_v39 }
 0x6c6   : > { %v1405_v21 = vpop.f32.mrf.mxu1 }
 0x6ce   : > { %v1407_v6 = vpop.f32.mrf.mxu1 }
 0x6cf   : > { %v1415_v27 = vpack.c.bf16 %v1407_v6, %v1405_v21 }
 0x6d1   : > { %1425 = vmatmul.bf16.vlgmr.msra.gmra.mxu2 %v1415_v27  ;;  %1453 = vmatmul.bf16.vlgmr.msrb.gmra.mxu0 %v1415_v27 }
 0x6d6   : > { %v1410_v36 = vpop.f32.mrf.mxu1 }
 0x6de   : > { %v1412_v10 = vpop.f32.mrf.mxu1 }
 0x6df   : > { %v1416_v59 = vpack.c.bf16 %v1412_v10, %v1410_v36 }
 0x6e1   : > { %1439 = vmatmul.bf16.vlgmr.msra.gmra.mxu3 %v1416_v59  ;;  %1467 = vmatmul.bf16.vlgmr.msrb.gmra.mxu1 %v1416_v59 }
 0x74e   : > { %v1454_v30 = vpop.f32.mrf.mxu0 }
 0x754   : > { %v1426_v38 = vpop.f32.mrf.mxu2 }
 0x756   : > { %v1456_v9 = vpop.f32.mrf.mxu0 }
 0x75c   : > { %v1428_v34 = vpop.f32.mrf.mxu2 }
 0x75e   : > { %v1468_v20 = vpop.f32.mrf.mxu1 }
 0x75f   : > { %v1469_v15 = vadd.f32 %v1468_v20, %v1454_v30 }
 0x761   : > { %v1475_v54 = vmul.f32 %v1469_v15, %v1469_v15 }
 0x764   : > { %v1440_v47 = vpop.f32.mrf.mxu3 }
 0x765   : > { %v1441_v33 = vadd.f32 %v1440_v47, %v1426_v38 }
 0x766   : > { %v1470_v56 = vpop.f32.mrf.mxu1 }
 0x767   : > { %v1473_v29 = vmul.f32 %v1441_v33, %v1441_v33  ;;  %v1471_v5 = vadd.f32 %v1470_v56, %v1456_v9 }
 0x769   : > { %v1477_v40 = vadd.f32 %v1475_v54, %v1473_v29  ;;  %v1476_v55 = vmul.f32 %v1471_v5, %v1471_v5 }
 0x76b   : > { %2233 = vtanh.f32 %v1477_v40 }
 0x76c   : > { %v1442_v24 = vpop.f32.mrf.mxu3 }
 0x76d   : > { %v1443_v23 = vadd.f32 %v1442_v24, %v1428_v34 }
 0x76f   : > { %v1474_v11 = vmul.f32 %v1443_v23, %v1443_v23 }
 0x771   : > { %v2234_v2 = vpop.eup %2233  ;;  %v1478_v31 = vadd.f32 %v1476_v55, %v1474_v11 }
 0x772   : > { %1481 = vst [vmem:[%s267_s20] sm:$0xff] %v2234_v2 }
 0x773   : > { %2235 = vtanh.f32 %v1478_v31 }
 0x779   : > { %v2236_v42 = vpop.eup %2235 }
 0x77a   : > { %1482 = vst [vmem:[%s267_s20 + $0x8] sm:$0xff] %v2236_v42 }
 0x77b   : > { %2384 = shalt.err (!%p2381_p10)
}
 0x77c   : > { %s2440_s6 = smov 128   ;;  %s2441_s28 = smov 8  }
 0x77d   : > { %2164 = dma.vmem_to_hbm [thread:$0]  (%p2552_p3), %s1497_s23, 256, %s1499_s24, %s1484_s9, %s2440_s6, %s2440_s6, %s2441_s28  }
 0x77e PF: > { %s1513_s21 = sand.u32 1, %s2419_s15   ;;  %p3113_p12 = scmp.ge.s32.totalorder %s2431_s18, 2 }
 0x77f   : > { %s1514_s26 = scalar_lea.sflag [#allocation4], %s1513_s21 }
 0x780   : > { %p2181_p13 = pnand %p3113_p12, %p2502_p6 }
 0x782   : > { %p2182_p0 = pneg %p2181_p13 }
 0x784   : > { %2414 = dma.done.wait (%p2182_p0), %s1514_s26, 256  }
 0x785   : > { %2416 = vsyncadd (%p2182_p0), %s1514_s26, 4294967040  ;;  %p19_p5 = scmp.ge.s32.totalorder %s2539_s25, 4   ;;  %s3114_s15 = smov %s2423_s16 }
 0x786   : > { %s3115_s16 = smov %s2427_s17  ;;  %s3116_s17 = smov %s2548_s30 }
 0x787   : > { %s3117_s18 = smov %s2539_s25  ;;  %21 = sbr.rel (!%p19_p5) target bundleno = 7 (0x7), region = 104 }
 0x78c   :  { %1520 = vsyncpa [#allocation3], 1 }
 0x78d   :  { %1522 = vsyncpa [#allocation3 + $0x1], 1 }
 0x78e   :  { %1523 = vsyncpa [#allocation6], 1 }
 0x78f   :  { %1524 = vsyncpa [#allocation9], 1 }
 0x790   :  { %1525 = vsyncpa [#allocation4], 1 }
 0x791   :  { %1527 = vsyncpa [#allocation4 + $0x1], 1 }

</bundles_post_ra>
